<compile_context>
chip_gen: v7x
topology: tpu7x:2x2x1
jax: 0.10.0
libtpu: 0.0.40
codegen_flags: <defaults>
</compile_context>

<pallas_src>
import functools

import numpy as np
import jax
import jax.numpy as jnp
from jax import lax
from jax.experimental import pallas as pl
from jax.experimental.pallas import tpu as pltpu

NOISE_STD = 0.005
_LANE = 128


def _round_up(v, m):
    return ((v + m - 1) // m) * m


@functools.lru_cache(maxsize=None)
def _selectors(out_f, in_f, out_cols):
    """0/1 selector matrices for the lane-dense per-sample noise matvec (bf16, exact).

    t_sel (in_f, out_f*in_f): (x @ t_sel)[b, o*in_f + i] == x[b, i]
    e_sel (out_f*in_f, out_cols): grouped sum over the in_f slots of each output o
                                  (out_cols >= out_f; extra columns stay zero).
    """
    t = np.tile(np.eye(in_f, dtype=np.float32), (1, out_f))
    e = np.zeros((out_f * in_f, out_cols), np.float32)
    e[np.arange(out_f * in_f), np.repeat(np.arange(out_f), in_f)] = 1.0
    return (jnp.asarray(t, dtype=jnp.bfloat16), jnp.asarray(e, dtype=jnp.bfloat16))


def _make_kernel(obs, nb_segs):
    """nb_segs: ((offset, width) into the f32 slab for each layer's noise bias)."""

    def kernel(slab_ref, n1_ref, n2_ref, n3_ref,
               w1_ref, b1_ref, t1_ref, e1_ref,
               w2_ref, b2_ref, t2_ref, e2_ref,
               w3_ref, b3_ref, t3_ref, e3_ref,
               o_ref):
        slab = slab_ref[...]                     # (TB, slab_w) f32: [x | nb1 | nb2 | nb3pad]
        h = slab[:, :obs]                        # (TB, obs) f32 activations
        layers = ((w1_ref, b1_ref, t1_ref, e1_ref, n1_ref),
                  (w2_ref, b2_ref, t2_ref, e2_ref, n2_ref),
                  (w3_ref, b3_ref, t3_ref, e3_ref, n3_ref))
        for (w_ref, b_ref, t_ref, e_ref, n_ref), (off, width) in zip(layers, nb_segs):
            nb = slab[:, off:off + width]        # (TB, out_cols) f32 noise bias
            # Base linear x @ W.T + b: contract x dim 1 with w dim 1 (PyTorch layout,
            # no transpose op needed).
            base = lax.dot_general(h, w_ref[...], (((1,), (1,)), ((), ())),
                                   preferred_element_type=jnp.float32) + b_ref[...]
            # Per-sample matvec einsum('boi,bi->bo') kept lane-dense via bf16 selector
            # matmuls on the MXU:  x_tiled[b, o*in+i] = x[b, i]  (exact 0/1 gather).
            x_tiled = jnp.dot(h.astype(jnp.bfloat16), t_ref[...],
                              preferred_element_type=jnp.float32)       # (TB, out*in) f32
            # f32 elementwise multiply (v5e has no bf16 VPU), bf16 operand into the
            # grouped-sum matmul (f32 accumulate).
            prod = (n_ref[...].astype(jnp.float32) * x_tiled).astype(jnp.bfloat16)
            o_n = jnp.dot(prod, e_ref[...],
                          preferred_element_type=jnp.float32)           # (TB, out_cols) f32
            h = jnp.tanh(base + o_n + nb)
        o_ref[...] = h                           # (TB, out_pad): lane-dense, unmasked store

    return kernel


def _vmem_budget_bytes():
    """~70% of this generation's per-core VMEM (64 MiB fallback == v7x, safe everywhere)."""
    cap = 64 * 1024 * 1024
    try:
        cap = int(pltpu.get_tpu_info().vmem_capacity_bytes)
    except Exception:
        pass
    return max(16 * 1024 * 1024, int(cap * 0.7))


def _pick_batch_tile(B, per_sample_stream, per_sample_scratch, vmem_budget, block_b):
    """Largest batch tile (multiple of 16, dividing B) whose double-buffered streamed
    bytes plus transient (TB, out*in) intermediates fit the VMEM budget, while keeping
    >= 4 grid steps so both v7x TensorCores still pipeline."""
    cap = max(16, vmem_budget // (2 * per_sample_stream + per_sample_scratch))
    if block_b is not None:
        cap = min(cap, block_b)
    if B >= 64:
        cap = min(cap, B // 4)
    cap = min(cap, B)
    tb = (cap // 16) * 16
    while tb >= 16 and B % tb:
        tb -= 16
    return tb if tb >= 16 else B


def net_forward(x, params, *, block_b=None):
    """x: (B, obs) f32.  params: w{i} (out,in) f32, b{i} (out,) f32,
    n{i} (B, out*in) bf16 (row-major (out,in) flattening), nb{i} (B, out) f32."""
    B, obs = x.shape
    dims = [params[f"w{i}"].shape for i in (1, 2, 3)]            # [(out, in)] * 3
    act = dims[2][0]
    out_pad = _round_up(act, _LANE)

    # Pack x and the three noise biases into one lane-dense f32 slab (single
    # per-sample DMA instead of four narrow-lane ones).  The last segment is
    # lane-aligned and out_pad wide so layer 3 runs fully at 128 output lanes.
    off1 = obs
    off2 = off1 + dims[0][0]
    off3 = _round_up(off2 + dims[1][0], _LANE)
    slab_w = off3 + out_pad
    slab = jnp.zeros((B, slab_w), jnp.float32)
    slab = slab.at[:, :obs].set(x)
    slab = slab.at[:, off1:off1 + dims[0][0]].set(params["nb1"])
    slab = slab.at[:, off2:off2 + dims[1][0]].set(params["nb2"])
    slab = slab.at[:, off3:off3 + act].set(params["nb3"])
    nb_segs = ((off1, dims[0][0]), (off2, dims[1][0]), (off3, out_pad))

    # Batch tile from the per-generation VMEM budget.
    sum_oi = sum(o * i for o, i in dims)
    max_oi = max(o * i for o, i in dims)
    per_sample_stream = 2 * sum_oi + 4 * slab_w + 4 * out_pad    # bf16 noise + f32 slab/out
    per_sample_scratch = 16 * max_oi                             # (TB, out*in) intermediates
    vmem_budget = _vmem_budget_bytes()
    tb = _pick_batch_tile(B, per_sample_stream, per_sample_scratch, vmem_budget, block_b)
    assert B % tb == 0

    def per_sample(cols):
        return pl.BlockSpec((tb, cols), lambda i: (i, 0))

    def resident(shape):
        return pl.BlockSpec(shape, lambda i: (0, 0))

    args = [slab]
    in_specs = [per_sample(slab_w)]
    # Per-sample noise: ~95% of HBM bytes, lane-dense bf16, double-buffered by the grid.
    # TODO(synk): generate this noise on-chip from per-sample seeds via
    # pltpu.prng_seed/prng_random_bits instead of streaming it from HBM — requires the
    # GA to define noise by seed (API change), so it stays a streamed input here.
    # (If profiling still shows exposed DMA at step boundaries after enlarging TB,
    #  add pipeline_mode=pl.Buffered(3) to these three specs.)
    for l in (1, 2, 3):
        args.append(params[f"n{l}"])
        in_specs.append(per_sample(params[f"n{l}"].shape[1]))

    flops = 0
    transcendentals = 0
    for l, (out_f, in_f) in enumerate(dims, start=1):
        w = params[f"w{l}"]
        b = params[f"b{l}"][None, :]
        out_cols = out_f
        if l == 3:                                 # zero-pad last layer to 128 lanes so the
            out_cols = out_pad                     # output store is a full unmasked tile
            w = jnp.zeros((out_pad, in_f), jnp.float32).at[:out_f].set(w)
            b = jnp.zeros((1, out_pad), jnp.float32).at[:, :out_f].set(b)
        t_sel, e_sel = _selectors(out_f, in_f, out_cols)
        args += [w, b, t_sel, e_sel]
        in_specs += [resident(w.shape), resident(b.shape),
                     resident(t_sel.shape), resident(e_sel.shape)]
        flops += 4 * B * out_f * in_f              # base matmul + noise matvec (mul+add)
        transcendentals += B * out_f               # tanh

    bytes_accessed = sum(int(a.size) * a.dtype.itemsize for a in args) + B * out_pad * 4

    out_padded = pl.pallas_call(
        _make_kernel(obs, nb_segs),
        out_shape=jax.ShapeDtypeStruct((B, out_pad), jnp.float32),
        grid=(B // tb,),
        in_specs=in_specs,
        out_specs=pl.BlockSpec((tb, out_pad), lambda i: (i, 0)),
        compiler_params=pltpu.CompilerParams(
            dimension_semantics=("parallel",),     # megacore batch sharding on v7x
            vmem_limit_bytes=vmem_budget,
        ),
        cost_estimate=pl.CostEstimate(
            flops=flops, transcendentals=transcendentals, bytes_accessed=bytes_accessed),
    )(*args)
    return out_padded[:, :act]


def net_forward_ref(x, params):
    """Pure-JAX reference matching the PyTorch forward exactly (same bf16 noise data)."""
    h = x
    for i in (1, 2, 3):
        w, b = params[f"w{i}"], params[f"b{i}"]
        out_f, in_f = w.shape
        n = params[f"n{i}"].astype(jnp.float32).reshape(-1, out_f, in_f)
        o = h @ w.T + b + jnp.einsum("boi,bi->bo", n, h) + params[f"nb{i}"]
        h = jnp.tanh(o)
    return h


def make_params(key, obs_size, hid_size, act_size, batch):
    sizes = [(hid_size, obs_size), (hid_size, hid_size), (act_size, hid_size)]
    params = {}
    for i, (out_f, in_f) in enumerate(sizes, start=1):
        key, kw, kb, kn, knb = jax.random.split(key, 5)
        params[f"w{i}"] = jax.random.normal(kw, (out_f, in_f), jnp.float32) * 0.1
        params[f"b{i}"] = jax.random.normal(kb, (out_f,), jnp.float32) * 0.1
        # Per-sample noise, flattened row-major over (out, in), stored in bf16:
        # lane-dense last dim (multiple of 128) and half the HBM bytes of the
        # bandwidth-dominating tensor.  NOISE_STD * N(0,1) is comfortably bf16.
        noise = NOISE_STD * jax.random.normal(kn, (batch, out_f * in_f), jnp.float32)
        params[f"n{i}"] = noise.astype(jnp.bfloat16)
        params[f"nb{i}"] = NOISE_STD * jax.random.normal(knb, (batch, out_f), jnp.float32)
    return params


if __name__ == "__main__":
    obs_size, hid_size, act_size, batch = 16, 32, 8, 256

    key = jax.random.PRNGKey(0)
    key, kx = jax.random.split(key)
    x = jax.random.normal(kx, (batch, obs_size), jnp.float32)
    params = make_params(key, obs_size, hid_size, act_size, batch)

    out = net_forward(x, params)        # auto batch tile -> >=4 pipelined grid steps
    out = jax.block_until_ready(out)

    ref = net_forward_ref(x, params)
    assert out.shape == (batch, act_size)
    # Noise data is identical on both paths (bf16-stored); the kernel does the base
    # matmul in f32 and only the noise term goes through bf16 MXU operands, so the
    # tanh-bounded outputs agree to well within 2e-3.
    err = float(jnp.max(jnp.abs(out - ref)))
    assert jnp.allclose(out, ref, atol=2e-3, rtol=2e-3), err

    print("KERNEL_OK")
</pallas_src>

<mosaic_0001>
module attributes {stable_mosaic.version = 11 : i64} {
  func.func @kernel(%arg0: i32, %arg1: memref<64x256xf32, #tpu.memory_space<vmem>>, %arg2: memref<64x512xbf16, #tpu.memory_space<vmem>>, %arg3: memref<64x1024xbf16, #tpu.memory_space<vmem>>, %arg4: memref<64x256xbf16, #tpu.memory_space<vmem>>, %arg5: memref<32x16xf32, #tpu.memory_space<vmem>>, %arg6: memref<1x32xf32, #tpu.memory_space<vmem>>, %arg7: memref<16x512xbf16, #tpu.memory_space<vmem>>, %arg8: memref<512x32xbf16, #tpu.memory_space<vmem>>, %arg9: memref<32x32xf32, #tpu.memory_space<vmem>>, %arg10: memref<1x32xf32, #tpu.memory_space<vmem>>, %arg11: memref<32x1024xbf16, #tpu.memory_space<vmem>>, %arg12: memref<1024x32xbf16, #tpu.memory_space<vmem>>, %arg13: memref<128x32xf32, #tpu.memory_space<vmem>>, %arg14: memref<1x128xf32, #tpu.memory_space<vmem>>, %arg15: memref<32x256xbf16, #tpu.memory_space<vmem>>, %arg16: memref<256x128xbf16, #tpu.memory_space<vmem>>, %arg17: memref<64x128xf32, #tpu.memory_space<vmem>>) attributes {dimension_semantics = [#tpu.dimension_semantics<parallel>], iteration_bounds = array<i64: 4>, scalar_prefetch = 0 : i64, scratch_operands = 0 : i64, tpu.core_type = #tpu.core_type<tc>, window_params = [{transform_indices = @transform_0, window_bounds = array<i64: 64, 256>}, {transform_indices = @transform_1, window_bounds = array<i64: 64, 512>}, {transform_indices = @transform_2, window_bounds = array<i64: 64, 1024>}, {transform_indices = @transform_3, window_bounds = array<i64: 64, 256>}, {pipeline_mode = #tpu.pipeline_mode<synchronous>, transform_indices = @transform_4, window_bounds = array<i64: 32, 16>}, {pipeline_mode = #tpu.pipeline_mode<synchronous>, transform_indices = @transform_5, window_bounds = array<i64: 1, 32>}, {pipeline_mode = #tpu.pipeline_mode<synchronous>, transform_indices = @transform_6, window_bounds = array<i64: 16, 512>}, {pipeline_mode = #tpu.pipeline_mode<synchronous>, transform_indices = @transform_7, window_bounds = array<i64: 512, 32>}, {pipeline_mode = #tpu.pipeline_mode<synchronous>, transform_indices = @transform_8, window_bounds = array<i64: 32, 32>}, {pipeline_mode = #tpu.pipeline_mode<synchronous>, transform_indices = @transform_9, window_bounds = array<i64: 1, 32>}, {pipeline_mode = #tpu.pipeline_mode<synchronous>, transform_indices = @transform_10, window_bounds = array<i64: 32, 1024>}, {pipeline_mode = #tpu.pipeline_mode<synchronous>, transform_indices = @transform_11, window_bounds = array<i64: 1024, 32>}, {pipeline_mode = #tpu.pipeline_mode<synchronous>, transform_indices = @transform_12, window_bounds = array<i64: 128, 32>}, {pipeline_mode = #tpu.pipeline_mode<synchronous>, transform_indices = @transform_13, window_bounds = array<i64: 1, 128>}, {pipeline_mode = #tpu.pipeline_mode<synchronous>, transform_indices = @transform_14, window_bounds = array<i64: 32, 256>}, {pipeline_mode = #tpu.pipeline_mode<synchronous>, transform_indices = @transform_15, window_bounds = array<i64: 256, 128>}, {transform_indices = @transform_16, window_bounds = array<i64: 64, 128>}]} {
    %c0 = arith.constant 0 : index
    %c0_0 = arith.constant 0 : index
    %0 = vector.load %arg1[%c0, %c0_0] : memref<64x256xf32, #tpu.memory_space<vmem>>, vector<64x256xf32>
    %1 = vector.extract_strided_slice %0 {offsets = [0, 0], sizes = [64, 16], strides = [1, 1]} : vector<64x256xf32> to vector<64x16xf32>
    %2 = vector.extract_strided_slice %0 {offsets = [0, 16], sizes = [64, 32], strides = [1, 1]} : vector<64x256xf32> to vector<64x32xf32>
    %c0_1 = arith.constant 0 : index
    %c0_2 = arith.constant 0 : index
    %3 = vector.load %arg5[%c0_1, %c0_2] : memref<32x16xf32, #tpu.memory_space<vmem>>, vector<32x16xf32>
    %cst = arith.constant dense<0.000000e+00> : vector<64x32xf32>
    %4 = tpu.matmul %1, %3, %cst {dimension_numbers = #tpu.dot_dimension_numbers<[1], [1], [0], [0], [0, 0, 1, 0], [], []>} : vector<64x16xf32>, vector<32x16xf32>, vector<64x32xf32> -> vector<64x32xf32>
    %c0_3 = arith.constant 0 : index
    %c0_4 = arith.constant 0 : index
    %5 = vector.load %arg6[%c0_3, %c0_4] : memref<1x32xf32, #tpu.memory_space<vmem>>, vector<1x32xf32>
    %6 = vector.broadcast %5 : vector<1x32xf32> to vector<64x32xf32>
    %7 = arith.addf %4, %6 : vector<64x32xf32>
    %8 = arith.truncf %1 : vector<64x16xf32> to vector<64x16xbf16>
    %c0_5 = arith.constant 0 : index
    %c0_6 = arith.constant 0 : index
    %9 = vector.load %arg7[%c0_5, %c0_6] : memref<16x512xbf16, #tpu.memory_space<vmem>>, vector<16x512xbf16>
    %cst_7 = arith.constant dense<0.000000e+00> : vector<64x512xf32>
    %10 = tpu.matmul %8, %9, %cst_7 {dimension_numbers = #tpu.dot_dimension_numbers<[1], [0], [0], [1], [0, 0, 1, 1], [], []>} : vector<64x16xbf16>, vector<16x512xbf16>, vector<64x512xf32> -> vector<64x512xf32>
    %c0_8 = arith.constant 0 : index
    %c0_9 = arith.constant 0 : index
    %11 = vector.load %arg2[%c0_8, %c0_9] : memref<64x512xbf16, #tpu.memory_space<vmem>>, vector<64x512xbf16>
    %12 = arith.extf %11 : vector<64x512xbf16> to vector<64x512xf32>
    %13 = arith.mulf %12, %10 : vector<64x512xf32>
    %14 = arith.truncf %13 : vector<64x512xf32> to vector<64x512xbf16>
    %c0_10 = arith.constant 0 : index
    %c0_11 = arith.constant 0 : index
    %15 = vector.load %arg8[%c0_10, %c0_11] : memref<512x32xbf16, #tpu.memory_space<vmem>>, vector<512x32xbf16>
    %cst_12 = arith.constant dense<0.000000e+00> : vector<64x32xf32>
    %16 = tpu.matmul %14, %15, %cst_12 {dimension_numbers = #tpu.dot_dimension_numbers<[1], [0], [0], [1], [0, 0, 1, 1], [], []>} : vector<64x512xbf16>, vector<512x32xbf16>, vector<64x32xf32> -> vector<64x32xf32>
    %17 = arith.addf %7, %16 : vector<64x32xf32>
    %18 = arith.addf %17, %2 : vector<64x32xf32>
    %19 = math.tanh %18 : vector<64x32xf32>
    %20 = vector.extract_strided_slice %0 {offsets = [0, 48], sizes = [64, 32], strides = [1, 1]} : vector<64x256xf32> to vector<64x32xf32>
    %c0_13 = arith.constant 0 : index
    %c0_14 = arith.constant 0 : index
    %21 = vector.load %arg9[%c0_13, %c0_14] : memref<32x32xf32, #tpu.memory_space<vmem>>, vector<32x32xf32>
    %cst_15 = arith.constant dense<0.000000e+00> : vector<64x32xf32>
    %22 = tpu.matmul %19, %21, %cst_15 {dimension_numbers = #tpu.dot_dimension_numbers<[1], [1], [0], [0], [0, 0, 1, 0], [], []>} : vector<64x32xf32>, vector<32x32xf32>, vector<64x32xf32> -> vector<64x32xf32>
    %c0_16 = arith.constant 0 : index
    %c0_17 = arith.constant 0 : index
    %23 = vector.load %arg10[%c0_16, %c0_17] : memref<1x32xf32, #tpu.memory_space<vmem>>, vector<1x32xf32>
    %24 = vector.broadcast %23 : vector<1x32xf32> to vector<64x32xf32>
    %25 = arith.addf %22, %24 : vector<64x32xf32>
    %26 = arith.truncf %19 : vector<64x32xf32> to vector<64x32xbf16>
    %c0_18 = arith.constant 0 : index
    %c0_19 = arith.constant 0 : index
    %27 = vector.load %arg11[%c0_18, %c0_19] : memref<32x1024xbf16, #tpu.memory_space<vmem>>, vector<32x1024xbf16>
    %cst_20 = arith.constant dense<0.000000e+00> : vector<64x1024xf32>
    %28 = tpu.matmul %26, %27, %cst_20 {dimension_numbers = #tpu.dot_dimension_numbers<[1], [0], [0], [1], [0, 0, 1, 1], [], []>} : vector<64x32xbf16>, vector<32x1024xbf16>, vector<64x1024xf32> -> vector<64x1024xf32>
    %c0_21 = arith.constant 0 : index
    %c0_22 = arith.constant 0 : index
    %29 = vector.load %arg3[%c0_21, %c0_22] : memref<64x1024xbf16, #tpu.memory_space<vmem>>, vector<64x1024xbf16>
    %30 = arith.extf %29 : vector<64x1024xbf16> to vector<64x1024xf32>
    %31 = arith.mulf %30, %28 : vector<64x1024xf32>
    %32 = arith.truncf %31 : vector<64x1024xf32> to vector<64x1024xbf16>
    %c0_23 = arith.constant 0 : index
    %c0_24 = arith.constant 0 : index
    %33 = vector.load %arg12[%c0_23, %c0_24] : memref<1024x32xbf16, #tpu.memory_space<vmem>>, vector<1024x32xbf16>
    %cst_25 = arith.constant dense<0.000000e+00> : vector<64x32xf32>
    %34 = tpu.matmul %32, %33, %cst_25 {dimension_numbers = #tpu.dot_dimension_numbers<[1], [0], [0], [1], [0, 0, 1, 1], [], []>} : vector<64x1024xbf16>, vector<1024x32xbf16>, vector<64x32xf32> -> vector<64x32xf32>
    %35 = arith.addf %25, %34 : vector<64x32xf32>
    %36 = arith.addf %35, %20 : vector<64x32xf32>
    %37 = math.tanh %36 : vector<64x32xf32>
    %38 = vector.extract_strided_slice %0 {offsets = [0, 128], sizes = [64, 128], strides = [1, 1]} : vector<64x256xf32> to vector<64x128xf32>
    %c0_26 = arith.constant 0 : index
    %c0_27 = arith.constant 0 : index
    %39 = vector.load %arg13[%c0_26, %c0_27] : memref<128x32xf32, #tpu.memory_space<vmem>>, vector<128x32xf32>
    %cst_28 = arith.constant dense<0.000000e+00> : vector<64x128xf32>
    %40 = tpu.matmul %37, %39, %cst_28 {dimension_numbers = #tpu.dot_dimension_numbers<[1], [1], [0], [0], [0, 0, 1, 0], [], []>} : vector<64x32xf32>, vector<128x32xf32>, vector<64x128xf32> -> vector<64x128xf32>
    %c0_29 = arith.constant 0 : index
    %c0_30 = arith.constant 0 : index
    %41 = vector.load %arg14[%c0_29, %c0_30] : memref<1x128xf32, #tpu.memory_space<vmem>>, vector<1x128xf32>
    %42 = vector.broadcast %41 : vector<1x128xf32> to vector<64x128xf32>
    %43 = arith.addf %40, %42 : vector<64x128xf32>
    %44 = arith.truncf %37 : vector<64x32xf32> to vector<64x32xbf16>
    %c0_31 = arith.constant 0 : index
    %c0_32 = arith.constant 0 : index
    %45 = vector.load %arg15[%c0_31, %c0_32] : memref<32x256xbf16, #tpu.memory_space<vmem>>, vector<32x256xbf16>
    %cst_33 = arith.constant dense<0.000000e+00> : vector<64x256xf32>
    %46 = tpu.matmul %44, %45, %cst_33 {dimension_numbers = #tpu.dot_dimension_numbers<[1], [0], [0], [1], [0, 0, 1, 1], [], []>} : vector<64x32xbf16>, vector<32x256xbf16>, vector<64x256xf32> -> vector<64x256xf32>
    %c0_34 = arith.constant 0 : index
    %c0_35 = arith.constant 0 : index
    %47 = vector.load %arg4[%c0_34, %c0_35] : memref<64x256xbf16, #tpu.memory_space<vmem>>, vector<64x256xbf16>
    %48 = arith.extf %47 : vector<64x256xbf16> to vector<64x256xf32>
    %49 = arith.mulf %48, %46 : vector<64x256xf32>
    %50 = arith.truncf %49 : vector<64x256xf32> to vector<64x256xbf16>
    %c0_36 = arith.constant 0 : index
    %c0_37 = arith.constant 0 : index
    %51 = vector.load %arg16[%c0_36, %c0_37] : memref<256x128xbf16, #tpu.memory_space<vmem>>, vector<256x128xbf16>
    %cst_38 = arith.constant dense<0.000000e+00> : vector<64x128xf32>
    %52 = tpu.matmul %50, %51, %cst_38 {dimension_numbers = #tpu.dot_dimension_numbers<[1], [0], [0], [1], [0, 0, 1, 1], [], []>} : vector<64x256xbf16>, vector<256x128xbf16>, vector<64x128xf32> -> vector<64x128xf32>
    %53 = arith.addf %43, %52 : vector<64x128xf32>
    %54 = arith.addf %53, %38 : vector<64x128xf32>
    %55 = math.tanh %54 : vector<64x128xf32>
    %c0_39 = arith.constant 0 : index
    %c0_40 = arith.constant 0 : index
    %56 = vector.load %arg17[%c0_39, %c0_40] : memref<64x128xf32, #tpu.memory_space<vmem>>, vector<64x128xf32>
    tpu.vector_store %arg17[%c0_39, %c0_40], %55 {strides = array<i32>} : memref<64x128xf32, #tpu.memory_space<vmem>>, vector<64x128xf32>,
    return
  }
  func.func @transform_0(%arg0: i32) -> (i32, i32) {
    %c0_i32 = arith.constant 0 : i32
    %c0_i32_0 = arith.constant 0 : i32
    return %arg0, %c0_i32 : i32, i32
  }
  func.func @transform_1(%arg0: i32) -> (i32, i32) {
    %c0_i32 = arith.constant 0 : i32
    %c0_i32_0 = arith.constant 0 : i32
    return %arg0, %c0_i32 : i32, i32
  }
  func.func @transform_2(%arg0: i32) -> (i32, i32) {
    %c0_i32 = arith.constant 0 : i32
    %c0_i32_0 = arith.constant 0 : i32
    return %arg0, %c0_i32 : i32, i32
  }
  func.func @transform_3(%arg0: i32) -> (i32, i32) {
    %c0_i32 = arith.constant 0 : i32
    %c0_i32_0 = arith.constant 0 : i32
    return %arg0, %c0_i32 : i32, i32
  }
  func.func @transform_4(%arg0: i32) -> (i32, i32) {
    %c0_i32 = arith.constant 0 : i32
    %c0_i32_0 = arith.constant 0 : i32
    %c0_i32_1 = arith.constant 0 : i32
    return %c0_i32, %c0_i32_0 : i32, i32
  }
  func.func @transform_5(%arg0: i32) -> (i32, i32) {
    %c0_i32 = arith.constant 0 : i32
    %c0_i32_0 = arith.constant 0 : i32
    %c0_i32_1 = arith.constant 0 : i32
    return %c0_i32, %c0_i32_0 : i32, i32
  }
  func.func @transform_6(%arg0: i32) -> (i32, i32) {
    %c0_i32 = arith.constant 0 : i32
    %c0_i32_0 = arith.constant 0 : i32
    %c0_i32_1 = arith.constant 0 : i32
    return %c0_i32, %c0_i32_0 : i32, i32
  }
  func.func @transform_7(%arg0: i32) -> (i32, i32) {
    %c0_i32 = arith.constant 0 : i32
    %c0_i32_0 = arith.constant 0 : i32
    %c0_i32_1 = arith.constant 0 : i32
    return %c0_i32, %c0_i32_0 : i32, i32
  }
  func.func @transform_8(%arg0: i32) -> (i32, i32) {
    %c0_i32 = arith.constant 0 : i32
    %c0_i32_0 = arith.constant 0 : i32
    %c0_i32_1 = arith.constant 0 : i32
    return %c0_i32, %c0_i32_0 : i32, i32
  }
  func.func @transform_9(%arg0: i32) -> (i32, i32) {
    %c0_i32 = arith.constant 0 : i32
    %c0_i32_0 = arith.constant 0 : i32
    %c0_i32_1 = arith.constant 0 : i32
    return %c0_i32, %c0_i32_0 : i32, i32
  }
  func.func @transform_10(%arg0: i32) -> (i32, i32) {
    %c0_i32 = arith.constant 0 : i32
    %c0_i32_0 = arith.constant 0 : i32
    %c0_i32_1 = arith.constant 0 : i32
    return %c0_i32, %c0_i32_0 : i32, i32
  }
  func.func @transform_11(%arg0: i32) -> (i32, i32) {
    %c0_i32 = arith.constant 0 : i32
    %c0_i32_0 = arith.constant 0 : i32
    %c0_i32_1 = arith.constant 0 : i32
    return %c0_i32, %c0_i32_0 : i32, i32
  }
  func.func @transform_12(%arg0: i32) -> (i32, i32) {
    %c0_i32 = arith.constant 0 : i32
    %c0_i32_0 = arith.constant 0 : i32
    %c0_i32_1 = arith.constant 0 : i32
    return %c0_i32, %c0_i32_0 : i32, i32
  }
  func.func @transform_13(%arg0: i32) -> (i32, i32) {
    %c0_i32 = arith.constant 0 : i32
    %c0_i32_0 = arith.constant 0 : i32
    %c0_i32_1 = arith.constant 0 : i32
    return %c0_i32, %c0_i32_0 : i32, i32
  }
  func.func @transform_14(%arg0: i32) -> (i32, i32) {
    %c0_i32 = arith.constant 0 : i32
    %c0_i32_0 = arith.constant 0 : i32
    %c0_i32_1 = arith.constant 0 : i32
    return %c0_i32, %c0_i32_0 : i32, i32
  }
  func.func @transform_15(%arg0: i32) -> (i32, i32) {
    %c0_i32 = arith.constant 0 : i32
    %c0_i32_0 = arith.constant 0 : i32
    %c0_i32_1 = arith.constant 0 : i32
    return %c0_i32, %c0_i32_0 : i32, i32
  }
  func.func @transform_16(%arg0: i32) -> (i32, i32) {
    %c0_i32 = arith.constant 0 : i32
    %c0_i32_0 = arith.constant 0 : i32
    return %arg0, %c0_i32 : i32, i32
  }
}

</mosaic_0001>

<bundles_post_ra>
// kernel: tpu_custom_call.1
= control target key start
LH: loop header
LB: loop body
LE: loop exit
PB: predicated region body
PF: predicated region fallthrough
CT: control target
= control target key end

     0   :  { %s6555_s0 = inlined_call_operand.hbm [shape: f32[256,256], index: 0, kind: input, shape index: {}]   ;;  %s6556_s1 = inlined_call_operand.hbm [shape: bf16[256,512], index: 1, kind: input, shape index: {}]   ;;  %s6557_s2 = inlined_call_operand.vmem [shape: bf16[256,1024], index: 2, kind: input, shape index: {}]   ;;  %s6558_s3 = inlined_call_operand.hbm [shape: bf16[256,256], index: 3, kind: input, shape index: {}]   ;;  %s6559_s4 = inlined_call_operand.vmem [shape: f32[32,16], index: 4, kind: input, shape index: {}]   ;;  %s6560_s5 = inlined_call_operand.vmem [shape: f32[1,32], index: 5, kind: input, shape index: {}]   ;;  %s6561_s6 = inlined_call_operand.hbm [shape: bf16[16,512], index: 6, kind: input, shape index: {}]   ;;  %s6562_s7 = inlined_call_operand.vmem [shape: bf16[512,32], index: 7, kind: input, shape index: {}]   ;;  %s6563_s8 = inlined_call_operand.vmem [shape: f32[32,32], index: 8, kind: input, shape index: {}]   ;;  %s6564_s9 = inlined_call_operand.vmem [shape: f32[1,32], index: 9, kind: input, shape index: {}]   ;;  %s6565_s10 = inlined_call_operand.hbm [shape: bf16[32,1024], index: 10, kind: input, shape index: {}]   ;;  %s6566_s11 = inlined_call_operand.vmem [shape: bf16[1024,32], index: 11, kind: input, shape index: {}]   ;;  %s6567_s12 = inlined_call_operand.vmem [shape: f32[128,32], index: 12, kind: input, shape index: {}]   ;;  %s6568_s13 = inlined_call_operand.vmem [shape: f32[1,128], index: 13, kind: input, shape index: {}]   ;;  %s6569_s14 = inlined_call_operand.hbm [shape: bf16[32,256], index: 14, kind: input, shape index: {}]   ;;  %s6570_s15 = inlined_call_operand.hbm [shape: bf16[256,128], index: 15, kind: input, shape index: {}]   ;;  %s6571_s16 = inlined_call_operand.hbm [shape: f32[256,128], index: 16, kind: output, shape index: {}]  }
   0x1   :  { %6605 = sst [smem:[#allocation26_spill]] %s6555_s0 }
   0x2   :  { %6606 = sst [smem:[#allocation27_spill]] %s6556_s1 }
   0x3   :  { %6607 = sst [smem:[#allocation28_spill]] %s6557_s2 }
   0x4   :  { %6608 = sst [smem:[#allocation29_spill]] %s6560_s5 }
   0x5   :  { %6609 = sst [smem:[#allocation30_spill]] %s6561_s6 }
   0x6   :  { %6610 = sst [smem:[#allocation31_spill]] %s6562_s7 }
   0x7   :  { %6611 = sst [smem:[#allocation32_spill]] %s6563_s8 }
   0x8   :  { %6612 = sst [smem:[#allocation33_spill]] %s6564_s9 }
   0x9   :  { %6613 = sst [smem:[#allocation34_spill]] %s6566_s11 }
   0xa   :  { %6614 = sst [smem:[#allocation35_spill]] %s6567_s12 }
   0xb   :  { %6615 = sst [smem:[#allocation36_spill]] %s6568_s13 }
   0xc   :  { %6616 = sst [smem:[#allocation37_spill]] %s6569_s14 }
   0xd   :  { %6617 = sst [smem:[#allocation38_spill]] %s6571_s16 }
   0xe   :  { %21 = vsyncpa [#allocation3], 0 }
   0xf   :  { %23 = vsyncpa [#allocation3 + $0x1], 0 }
  0x10   :  { %24 = vsyncpa [#allocation6], 0 }
  0x11   :  { %26 = vsyncpa [#allocation6 + $0x1], 0 }
  0x12   :  { %27 = vsyncpa [#allocation9], 0 }
  0x13   :  { %28 = vsyncpa [#allocation12], 0 }
  0x14   :  { %29 = vsyncpa [#allocation4], 0 }
  0x15   :  { %31 = vsyncpa [#allocation4 + $0x1], 0  ;;  %s5353_s21 = smov 0   ;;  %s5355_s22 = smov 0  }
  0x16   :  { %s5357_s23 = smov 0   ;;  %s5359_s24 = smov 0  }
  0x17 LB: > { %6618 = sst [smem:[#allocation20_spill]] %s5233_s21  ;;  %s5374_s25 = sadd.s32 4294967295, %s5245_s24   ;;  %s5245_s24 = sphi %s5359_s24, %s6671_s24   ;;  %s5241_s23 = sphi %s5357_s23, %s6673_s23   ;;  %s5237_s22 = sphi %s5355_s22, %s6675_s22   ;;  %s5233_s21 = sphi %s5353_s21, %s6674_s21  }
  0x18   : > { %6619 = sst [smem:[#allocation21_spill]] %s5241_s23  ;;  %s3928_s26 = sadd.s32 4294967294, %s5245_s24  }
  0x19   : > { %p57_p0 = scmp.ne.s32.totalorder %s5237_s22, %s5233_s21  ;;  %p6576_p1 = scmp.eq.s32.totalorder %s5374_s25, 0 }
  0x1a   : > { %p417_p3 = scmp.eq.s32.totalorder %s3928_s26, 3  ;;  %p3929_p5 = scmp.ge.s32.totalorder %s5245_s24, 1 }
  0x1b   : > { %p5383_p4 = por %p6576_p1, %p57_p0  ;;  %p424_p7 = scmp.lt.s32.totalorder %s5245_s24, 5 }
  0x1c   : > { %p5388_p6 = por %p417_p3, %p57_p0  ;;  %s5247_s30 = smov [#allocation8]  }
  0x1d   : > { %s6620_s27 = scalar_select %p5383_p4, 1, 0 }
  0x1e   : > { %s6621_s28 = scalar_select %p5388_p6, 1, 0 }
  0x1f   : > { %p5393_p8 = pnand %p3929_p5, %p424_p7  ;;  %s442_s0 = sshll.u32 %s5247_s30, 4  ;;  %s443_s0 = int_to_ptr.vmem [resolvable:$true] %s442_s0 }
  0x20   : > { %6622 = sst [smem:[#allocation22_spill]] %s6621_s28  ;;  %s5248_s18 = smov [#allocation11]  }
  0x21   : > { %s6623_s29 = scalar_select %p5393_p8, 1, 0 }
  0x22   : > { %p4699_p9 = pneg %p5393_p8  ;;  %s486_s19 = sshll.u32 %s5248_s18, 4  ;;  %s5405_s19 = int_to_ptr.vmem [resolvable:$true] %s486_s19 }
  0x23   : > { %s6625_s6 = sld [smem:[#allocation30_spill]] }
  0x24   : > { %p5401_p10 = pnand %p4699_p9, %p6576_p1 }
  0x26   : > { %s6624_s17 = scalar_select %p5401_p10, 1, 0 }
  0x27   : > { %p5415_p12 = pneg %p5401_p10 }
  0x29   : > { %s4965_s28 = scalar_lea.hbm %s6625_s6, 512 }
  0x2a   : > { %p4966_p11 = scmp.ne.s32.totalorder %s6625_s6, %s4965_s28  ;;  %p4972_p3 = scmp.lt.u32.totalorder %s4965_s28, %s6625_s6 }
  0x2b   : > { %s6626_s30 = scalar_select %p5415_p12, 1, 0 }
  0x2c   : > { %p4968_p13 = pnand %p5415_p12, %p4966_p11 }
  0x2e   : > { %p4969_p0 = pneg %p4968_p13 }
  0x30   : > { %p4974_p5 = pnand %p4972_p3, %p4969_p0 }
  0x32   : > { %4977 = shalt.err (!%p4974_p5)
}
  0x33   : > { %s4978_s20 = scalar_lea.vmem %s443_s0, 512  ;;  %p4986_p2 = scmp.lt.s32.totalorder %s443_s0, %s443_s0 }
  0x34   : > { %p4979_p7 = scmp.ne.s32.totalorder %s443_s0, %s4978_s20  ;;  %p4987_p6 = scmp.lt.s32.totalorder %s4978_s20, %s4978_s20 }
  0x36   : > { %p4981_p9 = pnand %p4979_p7, %p5415_p12  ;;  %p4988_p4 = por %p4987_p6, %p4986_p2 }
  0x38   : > { %p4982_p1 = pneg %p4981_p9 }
  0x3a   : > { %p4989_p8 = pnand %p4988_p4, %p4982_p1 }
  0x3c   : > { %4992 = shalt.err (!%p4989_p8)
}
  0x3d   : > { %s6583_s16 = smov 256   ;;  %s6585_s21 = smov 16  }
  0x3e   : > { %4702 = dma.hbm_to_vmem [thread:$0]  (!%p5401_p10), %s6625_s6, 512, %s443_s0, [#allocation9], %s6583_s16, %s6583_s16, %s6585_s21  }
  0x3f   : > { %s6627_s14 = sld [smem:[#allocation37_spill]] }
  0x45   : > { %s4993_s9 = scalar_lea.hbm %s6627_s14, 512 }
  0x46   : > { %p4994_p1 = scmp.ne.s32.totalorder %s6627_s14, %s4993_s9  ;;  %p5000_p6 = scmp.lt.u32.totalorder %s4993_s9, %s6627_s14 }
  0x48   : > { %p4996_p2 = pnand %p4994_p1, %p5415_p12 }
  0x4a   : > { %p4997_p4 = pneg %p4996_p2 }
  0x4c   : > { %p5002_p8 = pnand %p5000_p6, %p4997_p4 }
  0x4e   : > { %5005 = shalt.err (!%p5002_p8)
}
  0x4f   : > { %s5006_s0 = scalar_lea.vmem %s5405_s19, 512  ;;  %p5014_p3 = scmp.lt.s32.totalorder %s5405_s19, %s5405_s19 }
  0x50   : > { %p5007_p11 = scmp.ne.s32.totalorder %s5405_s19, %s5006_s0  ;;  %p5015_p5 = scmp.lt.s32.totalorder %s5006_s0, %s5006_s0 }
  0x52   : > { %p5009_p13 = pnand %p5007_p11, %p5415_p12  ;;  %p5016_p7 = por %p5015_p5, %p5014_p3 }
  0x54   : > { %p5010_p0 = pneg %p5009_p13 }
  0x56   : > { %p5017_p9 = pnand %p5016_p7, %p5010_p0 }
  0x58   : > { %5020 = shalt.err (!%p5017_p9)
}
  0x59   : > { %s6581_s12 = smov 128   ;;  %s6582_s2 = smov 8  }
  0x5a   : > { %4708 = dma.hbm_to_vmem [thread:$0]  (!%p5401_p10), %s6627_s14, 512, %s5405_s19, [#allocation12], %s6581_s12, %s6581_s12, %s6582_s2  }
  0x5b   : > { %s5461_s13 = sadd.s32 1, %s5245_s24   ;;  %s44_s26 = sadd.s32 1, %s5241_s23 }
  0x5c   : > { %6628 = sst [smem:[#allocation23_spill]] %s5461_s13  ;;  %s41_s28 = ssub.s32 %s5245_s24, %s5461_s13 }
  0x5d   : > { %p42_p1 = scmp.eq.s32.totalorder %s41_s28, 0  ;;  %p51_p2 = scmp.ne.s32.totalorder %s5241_s23, %s5237_s22 }
  0x5e   : > { %p52_p4 = scmp.eq.s32.totalorder %s5245_s24, 0  ;;  %p6630_p8 = scmp.eq.s32.totalorder %s5374_s25, 3 }
  0x5f   : > { %s5470_s18 = scalar_select %p42_p1, %s5241_s23, %s44_s26  }
  0x60   : > { %p53_p6 = por %p52_p4, %p51_p2  ;;  %p5474_p11 = por %p6630_p8, %p51_p2 }
  0x61   : > { %6629 = sst [smem:[#allocation24_spill]] %s5470_s18  ;;  %p4730_p13 = scmp.lt.s32.totalorder %s5245_s24, 4 }
  0x62   : > { %s6631_s20 = scalar_select %p5474_p11, 1, 0 }
  0x63   : > { %s5480_s0 = sand.u32 1, %s5241_s23   ;;  %s6589_s9 = sshll.u32 %s5245_s24, 11 }
  0x64   : > { %6632 = sst [smem:[#allocation25_spill]] %s6631_s20  ;;  %s6588_s19 = sshll.u32 %s5480_s0, 7 }
  0x65   : > { %p5484_p0 = pnand %p4730_p13, %p53_p6  ;;  %s535_s28 = sand.u32 1, %s5245_s24  }
  0x66   : > { %s6634_s1 = sld [smem:[#allocation27_spill]]  ;;  %s539_s16 = scalar_lea.vmem [#allocation5], %s6588_s19 }
  0x67   : > { %s6633_s11 = scalar_select %p5484_p0, 1, 0 }
  0x68   : > { %s547_s21 = sshll.u32 %s539_s16, 4  ;;  %s5253_s6 = smov [#allocation10]   ;;  %s5498_s21 = int_to_ptr.vmem [resolvable:$true] %s547_s21 }
  0x69   : > { %s5500_s14 = sshll.u32 %s5253_s6, 4  ;;  %s5502_s18 = scalar_lea.sflag [#allocation6], %s535_s28  ;;  %s465_s14 = int_to_ptr.vmem [resolvable:$true] %s5500_s14 }
  0x6a   : > { %p5508_p5 = pneg %p5484_p0 }
  0x6c   : > { %s5494_s2 = scalar_lea.hbm %s6634_s1, %s6589_s9  ;;  %s5026_s19 = scalar_lea.hbm %s6634_s1, 8192 }
  0x6d   : > { %s5021_s23 = scalar_lea.hbm %s5494_s2, 2048  ;;  %p5027_p1 = scmp.lt.u32.totalorder %s5494_s2, %s6634_s1 }
  0x6e   : > { %p5022_p3 = scmp.ne.s32.totalorder %s5494_s2, %s5021_s23  ;;  %p5028_p2 = scmp.lt.u32.totalorder %s5026_s19, %s5021_s23 }
  0x6f   : > { %s6635_s12 = scalar_select %p5508_p5, 1, 0 }
  0x70   : > { %p5024_p7 = pnand %p5508_p5, %p5022_p3  ;;  %p5029_p4 = por %p5028_p2, %p5027_p1 }
  0x71   : > { %p5030_p6 = scmp.lt.u32.totalorder %s5021_s23, %s5494_s2 }
  0x72   : > { %p5025_p9 = pneg %p5024_p7 }
  0x73   : > { %p5031_p8 = por %p5030_p6, %p5029_p4 }
  0x75   : > { %p5032_p13 = pnand %p5031_p8, %p5025_p9 }
  0x77   : > { %5035 = shalt.err (!%p5032_p13)
}
  0x78   : > { %s5036_s28 = scalar_lea.vmem %s5498_s21, 2048  ;;  %s5254_s26 = smov [#allocation5]  }
  0x79   : > { %p5037_p3 = scmp.ne.s32.totalorder %s5498_s21, %s5036_s28  ;;  %s5041_s16 = sshll.u32 %s5254_s26, 4  ;;  %s5042_s16 = int_to_ptr.vmem [resolvable:$false] %s5041_s16 }
  0x7a   : > { %s5043_s9 = scalar_lea.vmem %s5042_s16, 4096  ;;  %p5044_p10 = scmp.lt.s32.totalorder %s5498_s21, %s5042_s16 }
  0x7b   : > { %p5039_p7 = pnand %p5037_p3, %p5508_p5  ;;  %p5045_p12 = scmp.lt.s32.totalorder %s5043_s9, %s5036_s28 }
  0x7d   : > { %p5040_p11 = pneg %p5039_p7  ;;  %p5046_p1 = por %p5045_p12, %p5044_p10 }
  0x7f   : > { %p5047_p2 = pnand %p5046_p1, %p5040_p11 }
  0x81   : > { %5050 = shalt.err (!%p5047_p2)
}
  0x82   : > { %s6636_s23 = smov 16   ;;  %s6637_s19 = smov 256  }
  0x83   : > { %4718 = dma.hbm_to_vmem [thread:$0]  (!%p5484_p0), %s5494_s2, 2048, %s5498_s21, %s5502_s18, %s6637_s19, %s6637_s19, %s6636_s23  }
  0x84   : > { %s5051_s16 = scalar_lea.hbm %s6565_s10, 2048  ;;  %p6638_p12 = scmp.ne.s32.totalorder %s6626_s30, 0 }
  0x85   : > { %p5052_p10 = scmp.ne.s32.totalorder %s6565_s10, %s5051_s16  ;;  %p5058_p4 = scmp.lt.u32.totalorder %s5051_s16, %s6565_s10 }
  0x87   : > { %p5054_p11 = pnand %p5052_p10, %p6638_p12 }
  0x89   : > { %p5055_p9 = pneg %p5054_p11 }
  0x8b   : > { %p5060_p6 = pnand %p5058_p4, %p5055_p9 }
  0x8d   : > { %5063 = shalt.err (!%p5060_p6)
}
  0x8e   : > { %s5064_s20 = scalar_lea.vmem %s465_s14, 2048  ;;  %p5072_p7 = scmp.lt.s32.totalorder %s465_s14, %s465_s14 }
  0x8f   : > { %p5065_p8 = scmp.ne.s32.totalorder %s465_s14, %s5064_s20  ;;  %p5073_p1 = scmp.lt.s32.totalorder %s5064_s20, %s5064_s20 }
  0x91   : > { %p5067_p13 = pnand %p5065_p8, %p6638_p12  ;;  %p5074_p2 = por %p5073_p1, %p5072_p7 }
  0x93   : > { %p5068_p3 = pneg %p5067_p13 }
  0x95   : > { %p5075_p0 = pnand %p5074_p2, %p5068_p3 }
  0x97   : > { %5078 = shalt.err (!%p5075_p0)
}
  0x98   : > { %s5255_s21 = smov 512   ;;  %s5256_s2 = smov 32  }
  0x99   : > { %p6639_p10 = scmp.ne.s32.totalorder %s6624_s17, 0  ;;  %s5257_s6 = smov [#allocation13]  }
  0x9a   : > { %s499_s26 = sshll.u32 %s5257_s6, 4  ;;  %s5079_s9 = scalar_lea.hbm %s6570_s15, 2048  ;;  %s500_s26 = int_to_ptr.vmem [resolvable:$true] %s499_s26 }
  0x9b   : > { %4705 = dma.hbm_to_vmem [thread:$0]  (!%p6639_p10), %s6565_s10, 2048, %s465_s14, [#allocation9], %s5255_s21, %s5255_s21, %s5256_s2  }
  0x9c   : > { %p5080_p0 = scmp.ne.s32.totalorder %s6570_s15, %s5079_s9  ;;  %p5086_p4 = scmp.lt.u32.totalorder %s5079_s9, %s6570_s15 }
  0x9e   : > { %p5082_p11 = pnand %p5080_p0, %p6638_p12 }
  0xa0   : > { %p5083_p9 = pneg %p5082_p11 }
  0xa2   : > { %p5088_p6 = pnand %p5086_p4, %p5083_p9 }
  0xa4   : > { %5091 = shalt.err (!%p5088_p6)
}
  0xa5   : > { %s5092_s14 = scalar_lea.vmem %s500_s26, 2048  ;;  %p5100_p7 = scmp.lt.s32.totalorder %s500_s26, %s500_s26 }
  0xa6   : > { %p5093_p8 = scmp.ne.s32.totalorder %s500_s26, %s5092_s14  ;;  %p5101_p1 = scmp.lt.s32.totalorder %s5092_s14, %s5092_s14 }
  0xa8   : > { %p5095_p13 = pnand %p5093_p8, %p6638_p12  ;;  %p5102_p2 = por %p5101_p1, %p5100_p7 }
  0xaa   : > { %p5096_p3 = pneg %p5095_p13 }
  0xac   : > { %p5103_p5 = pnand %p5102_p2, %p5096_p3 }
  0xae   : > { %5106 = shalt.err (!%p5103_p5)
}
  0xaf   : > { %s5258_s5 = smov 64   ;;  %s5259_s7 = smov 4  }
  0xb0   : > { %4711 = dma.hbm_to_vmem [thread:$0]  (!%p6639_p10), %s6570_s15, 2048, %s500_s26, [#allocation12], %s5258_s5, %s5258_s5, %s5259_s7  }
  0xb1   : > { %s6640_s30 = sshll.u32 %s5245_s24, 11  ;;  %s6641_s13 = sld [smem:[#allocation26_spill]] }
  0xb2   : > { %s6642_s16 = sshll.u32 %s5480_s0, 7  ;;  %s3943_s17 = sshll.u32 %s5480_s0, 6 }
  0xb3   : > { %s517_s28 = scalar_lea.vmem [#allocation2], %s6642_s16  ;;  %s514_s20 = scalar_lea.sflag [#allocation3], %s5480_s0 }
  0xb4   : > { %s525_s9 = sshll.u32 %s517_s28, 4  ;;  %p6643_p12 = scmp.ne.s32.totalorder %s6635_s12, 0  ;;  %s5581_s9 = int_to_ptr.vmem [resolvable:$true] %s525_s9 }
  0xb7   : > { %s5577_s6 = scalar_lea.hbm %s6641_s13, %s6640_s30  ;;  %s5112_s7 = scalar_lea.hbm %s6641_s13, 8192 }
  0xb8   : > { %s5107_s14 = scalar_lea.hbm %s5577_s6, 2048  ;;  %p5113_p11 = scmp.lt.u32.totalorder %s5577_s6, %s6641_s13 }
  0xb9   : > { %p5108_p5 = scmp.ne.s32.totalorder %s5577_s6, %s5107_s14  ;;  %p5114_p9 = scmp.lt.u32.totalorder %s5112_s7, %s5107_s14 }
  0xba   : > { %p5116_p6 = scmp.lt.u32.totalorder %s5107_s14, %s5577_s6 }
  0xbb   : > { %p5110_p10 = pnand %p5108_p5, %p6643_p12  ;;  %p5115_p4 = por %p5114_p9, %p5113_p11 }
  0xbd   : > { %p5111_p0 = pneg %p5110_p10  ;;  %p5117_p8 = por %p5116_p6, %p5115_p4 }
  0xbf   : > { %p5118_p13 = pnand %p5117_p8, %p5111_p0 }
  0xc1   : > { %5121 = shalt.err (!%p5118_p13)
}
  0xc2   : > { %s5122_s30 = scalar_lea.vmem %s5581_s9, 2048  ;;  %s5260_s2 = smov [#allocation2]  }
  0xc3   : > { %p5123_p3 = scmp.ne.s32.totalorder %s5581_s9, %s5122_s30  ;;  %s5127_s1 = sshll.u32 %s5260_s2, 4  ;;  %s5128_s1 = int_to_ptr.vmem [resolvable:$false] %s5127_s1 }
  0xc4   : > { %s5129_s16 = scalar_lea.vmem %s5128_s1, 4096  ;;  %p5130_p2 = scmp.lt.s32.totalorder %s5581_s9, %s5128_s1 }
  0xc5   : > { %p5125_p7 = pnand %p5123_p3, %p6643_p12  ;;  %p5131_p5 = scmp.lt.s32.totalorder %s5129_s16, %s5122_s30 }
  0xc7   : > { %p5126_p1 = pneg %p5125_p7  ;;  %p5132_p10 = por %p5131_p5, %p5130_p2 }
  0xc9   : > { %p5133_p11 = pnand %p5132_p10, %p5126_p1 }
  0xcb   : > { %5136 = shalt.err (!%p5133_p11)
}
  0xcc   : > { %p6644_p0 = scmp.ne.s32.totalorder %s6633_s11, 0  ;;  %s4184_s28 = sshll.u32 %s5245_s24, 10 }
  0xcd   : > { %s5615_s5 = scalar_lea.hbm %s6558_s3, %s4184_s28  ;;  %s571_s7 = scalar_lea.vmem [#allocation7], %s3943_s17 }
  0xce   : > { %4715 = dma.hbm_to_vmem [thread:$0]  (!%p6644_p0), %s5577_s6, 2048, %s5581_s9, %s514_s20, %s6637_s19, %s6637_s19, %s6636_s23  }
  0xcf   : > { %s579_s8 = sshll.u32 %s571_s7, 4  ;;  %s5137_s21 = scalar_lea.hbm %s5615_s5, 1024  ;;  %s5619_s8 = int_to_ptr.vmem [resolvable:$true] %s579_s8 }
  0xd0   : > { %p5138_p9 = scmp.ne.s32.totalorder %s5615_s5, %s5137_s21  ;;  %s5142_s6 = scalar_lea.hbm %s6558_s3, 4096 }
  0xd1   : > { %p5143_p8 = scmp.lt.u32.totalorder %s5615_s5, %s6558_s3  ;;  %p5144_p13 = scmp.lt.u32.totalorder %s5142_s6, %s5137_s21 }
  0xd2   : > { %p5140_p4 = pnand %p5138_p9, %p6643_p12  ;;  %p5146_p7 = scmp.lt.u32.totalorder %s5137_s21, %s5615_s5 }
  0xd3   : > { %p5145_p3 = por %p5144_p13, %p5143_p8 }
  0xd4   : > { %p5141_p6 = pneg %p5140_p4 }
  0xd5   : > { %p5147_p1 = por %p5146_p7, %p5145_p3 }
  0xd7   : > { %p5148_p2 = pnand %p5147_p1, %p5141_p6 }
  0xd9   : > { %5151 = shalt.err (!%p5148_p2)
}
  0xda   : > { %s5152_s0 = scalar_lea.vmem %s5619_s8, 1024  ;;  %s5261_s17 = smov [#allocation7]  }
  0xdb   : > { %p5153_p5 = scmp.ne.s32.totalorder %s5619_s8, %s5152_s0  ;;  %s5157_s30 = sshll.u32 %s5261_s17, 4  ;;  %s5158_s30 = int_to_ptr.vmem [resolvable:$false] %s5157_s30 }
  0xdc   : > { %s5159_s2 = scalar_lea.vmem %s5158_s30, 2048  ;;  %p5160_p9 = scmp.lt.s32.totalorder %s5619_s8, %s5158_s30 }
  0xdd   : > { %p5155_p10 = pnand %p5153_p5, %p6643_p12  ;;  %p5161_p4 = scmp.lt.s32.totalorder %s5159_s2, %s5152_s0 }
  0xdf   : > { %p5156_p11 = pneg %p5155_p10  ;;  %p5162_p8 = por %p5161_p4, %p5160_p9 }
  0xe1   : > { %p5163_p13 = pnand %p5162_p8, %p5156_p11 }
  0xe3   : > { %5166 = shalt.err (!%p5163_p13)
}
  0xe4   : > { %s6645_s1 = smov 8   ;;  %s6646_s16 = smov 128  }
  0xe5   : > { %4721 = dma.hbm_to_vmem [thread:$0]  (!%p6644_p0), %s5615_s5, 1024, %s5619_s8, %s5502_s18, %s6646_s16, %s6646_s16, %s6645_s1  }
  0xe6   : > { %p6647_p12 = scmp.ne.s32.totalorder %s6623_s29, 0 }
  0xe7   : > { %s5649_s12 = sand.u32 (!%p6647_p12), 1, %s5237_s22   ;;  %p6648_p6 = scmp.ne.s32.totalorder (!%p6647_p12), %s6620_s27, 0 }
  0xe8   : > { %591 = sbr.rel (%p6647_p12) target bundleno = 1740 (0x6cc), region = 84  ;;  %s3948_s28 = sshll.u32 (!%p6647_p12), %s5649_s12, 7 }
  0xe9   : > { %s594_s14 = scalar_lea.sflag (!%p6647_p12), [#allocation3], %s5649_s12  ;;  %s5653_s26 = scalar_lea.vmem (!%p6647_p12), [#allocation2], %s3948_s28 }
  0xef   : > { %5212 = dma.done.wait (%p6648_p6), %s594_s14, 2048  }
  0xf0   : > { %5214 = vsyncadd (%p6648_p6), %s594_s14, 4294965248  ;;  %s602_s18 = sand.u32 1, %s5374_s25   ;;  %s5660_s11 = scalar_lea.vmem [#allocation5], %s3948_s28 }
  0xf1   : > { %s603_s29 = scalar_lea.sflag [#allocation6], %s602_s18 }
  0xf2   : > { %5216 = dma.done.wait (%p6648_p6), %s603_s29, 3072  }
  0xf3   : > { %5218 = vsyncadd (%p6648_p6), %s603_s29, 4294964224  ;;  %s3950_s5 = sshll.u32 %s5649_s12, 6  ;;  %p6649_p0 = scmp.eq.s32.totalorder %s5374_s25, 0 }
  0xf4   : > { %s5669_s7 = scalar_lea.vmem [#allocation7], %s3950_s5 }
  0xf5   : > { %5220 = dma.done.wait (%p6649_p0), [#allocation9], 2560   ;;  %p6650_p3 = pmov %p6649_p0 }
  0xf6   : > { %p6651_p7 = pmov %p6649_p0 }
  0xf7   : > { %5222 = vsyncadd (%p6650_p3), [#allocation9], 4294964736 }
  0xf8   : > { %5224 = dma.done.wait (%p6651_p7), [#allocation12], 2560   ;;  %p6652_p1 = pmov %p6649_p0 }
  0xf9   : > { %vm735_vm0 = vcmask 130048   ;;  %v724_v1 = vld [vmem:[%s6559_s4] sm:$0xff]  ;;  %v725_v2 = vld [vmem:[%s6559_s4 + $0x8] sm:$0xff]  ;;  %v726_v3 = vld [vmem:[%s6559_s4 + $0x10] sm:$0xff]  ;;  %s6655_s30 = sld [smem:[#allocation31_spill]]  ;;  %v5262_v24 = vmov 0  }
  0xfa   : > { %5226 = vsyncadd (%p6652_p1), [#allocation12], 4294964736  ;;  %v4599_v4 = vpack.c.bf16 %v725_v2, %v724_v1  ;;  %v727_v5 = vld [vmem:[%s6559_s4 + $0x18] sm:$0xff]  ;;  %v5698_v6 = vld [vmem:[%s5653_s26] sm:$0xff]  ;;  %s5263_s19 = smov 112   ;;  %s6656_s9 = sld [smem:[#allocation32_spill]] }
  0xfb   : > { %vm5681_vm1 = vmpackc.low %vm735_vm0, %vm735_vm0  ;;  %v5701_v7 = vld [vmem:[%s5653_s26 + $0x40] sm:$0xff]  ;;  %v4605_v8 = vpack.c.bf16 %v727_v5, %v726_v3  ;;  %4523 = vmatprep.mubr.msk.f32.mxu0 %vm735_vm0, %v5698_v6  ;;  %v4790_v10 = vld [vmem:[#allocation8 + $0xc] ss:$16 sps:$4 sm:$0xff]   ;;  %1553 = vrot.lane.b32.xlu0 %v5698_v6, %s5263_s19  ;;  %vm1604_vm2 = vcmask 261120   ;;  %s6659_s18 = sld [smem:[#allocation29_spill]]  ;;  %s6660_s8 = sld [smem:[#allocation34_spill]] }
  0xfc   : > { %4529 = vmatprep.mubr.msk.f32.mxu1 %vm735_vm0, %v5701_v7  ;;  %4601 = vmatprep.subr.msk.bf16.mxu0 %vm5681_vm1, %v4599_v4  ;;  %v4787_v9 = vld [vmem:[#allocation8 + $0x4] ss:$16 sps:$4 sm:$0xff]   ;;  %v4785_v13 = vld [vmem:[#allocation8] ss:$16 sps:$4 sm:$0xff]   ;;  %v4788_v14 = vld [vmem:[#allocation8 + $0x8] ss:$16 sps:$4 sm:$0xff]  }
  0xfd   : > { %4671 = vmatprep.subr.msk.bf16.mxu1 %vm5681_vm1, %v4599_v4  ;;  %4604 = vmatpush3.bf16.xpose.msk.msra.mxu0 %vm5681_vm1, %v4599_v4  ;;  %v5724_v11 = vld [vmem:[%s5653_s26 + $0x10] sm:$0xff]  ;;  %v5730_v15 = vld [vmem:[%s5653_s26 + $0x20] sm:$0xff]  ;;  %v1064_v63 = vld [vmem:[%s5660_s11 + $0x8] sm:$0xff]  ;;  %s6661_s17 = sld [smem:[#allocation28_spill]]  ;;  %s6662_s16 = sld [smem:[#allocation35_spill]] }
  0xfe   : > { %4673 = vmatpush3.bf16.xpose.msk.msra.mxu1 %vm5681_vm1, %v4599_v4  ;;  %4607 = vmatprep.subr.msk.bf16.mxu0 %vm5681_vm1, %v4605_v8  ;;  %v5727_v12 = vld [vmem:[%s5653_s26 + $0x50] sm:$0xff]  ;;  %v5733_v16 = vld [vmem:[%s5653_s26 + $0x60] sm:$0xff]  ;;  %v877_v21 = vpack.c.bf16 %v5724_v11, %v5698_v6  ;;  %v1066_v1 = vld [vmem:[%s5660_s11 + $0x18] sm:$0xff]  ;;  %v1081_v5 = vunpack.c.l.bf16 %v1064_v63  ;;  %s6664_s27 = sld [smem:[#allocation36_spill]]  ;;  %s6485_s21 = scalar_lea.vmem [#allocation14], %s3950_s5 }
  0xff   : > { %4672 = vmatprep.subr.msk.bf16.mxu1 %vm5681_vm1, %v4605_v8  ;;  %v4791_v17 = vld [vmem:[%s6655_s30 + $0x40] sm:$0xff]   ;;  %v5746_v19 = vld [vmem:[%s5653_s26 + $0x30] sm:$0xff]  ;;  %v4795_v25 = vld [vmem:[%s6655_s30 + $0x48] sm:$0xff]   ;;  %v879_v38 = vpack.c.bf16 %v5727_v12, %v5701_v7  ;;  %1557 = vrot.lane.b32.xlu1 %v5730_v15, %s5263_s19  ;;  %s6665_s5 = sld [smem:[#allocation25_spill]]  ;;  %s4186_s23 = sshll.u32 %s5374_s25, 10 }
 0x100   : > { %v4792_v18 = vld [vmem:[%s6655_s30 + $0xc0] sm:$0xff]   ;;  %v5749_v20 = vld [vmem:[%s5653_s26 + $0x70] sm:$0xff]  ;;  %v4796_v26 = vld [vmem:[%s6655_s30 + $0xc8] sm:$0xff]   ;;  %v878_v31 = vpack.c.bf16 %v5746_v19, %v5730_v15  ;;  %1555 = vrot.lane.b32.xlu0 %v5724_v11, %s5263_s19  ;;  %s6666_s20 = sld [smem:[#allocation38_spill]] }
 0x101   : > { %v4793_v22 = vld [vmem:[%s6655_s30] sm:$0xff]   ;;  %v4797_v27 = vld [vmem:[%s6655_s30 + $0x8] sm:$0xff]   ;;  %v4799_v29 = vld [vmem:[%s6655_s30 + $0x50] sm:$0xff]   ;;  %v880_v39 = vpack.c.bf16 %v5749_v20, %v5733_v16 }
 0x102   : > { %v4794_v23 = vld [vmem:[%s6655_s30 + $0x80] sm:$0xff]   ;;  %v4798_v28 = vld [vmem:[%s6655_s30 + $0x88] sm:$0xff]   ;;  %v4800_v30 = vld [vmem:[%s6655_s30 + $0xd0] sm:$0xff]  }
 0x103   : > { %v4801_v32 = vld [vmem:[%s6655_s30 + $0x10] sm:$0xff]   ;;  %v4803_v34 = vld [vmem:[%s6655_s30 + $0x58] sm:$0xff]   ;;  %v4807_v40 = vld [vmem:[%s6655_s30 + $0x60] sm:$0xff]   ;;  %1559 = vrot.lane.b32.xlu1 %v5746_v19, %s5263_s19 }
 0x104   : > { %v4802_v33 = vld [vmem:[%s6655_s30 + $0x90] sm:$0xff]   ;;  %v4804_v35 = vld [vmem:[%s6655_s30 + $0xd8] sm:$0xff]   ;;  %v4808_v41 = vld [vmem:[%s6655_s30 + $0xe0] sm:$0xff]   ;;  %1561 = vrot.lane.b32.xlu0 %v5701_v7, %s5263_s19  ;;  %v1085_v7 = vunpack.c.l.bf16 %v1066_v1 }
 0x105   : > { %4610 = vmatpush3.bf16.xpose.msk.msra.mxu0 %vm5681_vm1, %v4605_v8  ;;  %v4805_v36 = vld [vmem:[%s6655_s30 + $0x18] sm:$0xff]   ;;  %v4809_v42 = vld [vmem:[%s6655_s30 + $0x20] sm:$0xff]   ;;  %v4811_v44 = vld [vmem:[%s6655_s30 + $0x68] sm:$0xff]   ;;  %p6667_p10 = scmp.ne.s32.totalorder %s6665_s5, 0 }
 0x106   : > { %4674 = vmatpush3.bf16.xpose.msk.msra.mxu1 %vm5681_vm1, %v4605_v8  ;;  %990 = vmatprep.subr.bf16.mxu0 %v4790_v10  ;;  %v4806_v37 = vld [vmem:[%s6655_s30 + $0x98] sm:$0xff]   ;;  %v4810_v43 = vld [vmem:[%s6655_s30 + $0xa0] sm:$0xff]   ;;  %v4812_v45 = vld [vmem:[%s6655_s30 + $0xe8] sm:$0xff]   ;;  %s6508_s0 = scalar_lea.hbm %s6666_s20, %s4186_s23 }
 0x107   : > { %917 = vmatprep.subr.bf16.mxu1 %v4787_v9  ;;  %v4813_v46 = vld [vmem:[%s6655_s30 + $0x28] sm:$0xff]   ;;  %v4815_v48 = vld [vmem:[%s6655_s30 + $0x70] sm:$0xff]   ;;  %v4819_v52 = vld [vmem:[%s6655_s30 + $0x78] sm:$0xff]   ;;  %1563 = vrot.lane.b32.xlu1 %v5727_v12, %s5263_s19 }
 0x108   : > { %v4814_v47 = vld [vmem:[%s6655_s30 + $0xa8] sm:$0xff]   ;;  %v4816_v49 = vld [vmem:[%s6655_s30 + $0xf0] sm:$0xff]   ;;  %v4820_v53 = vld [vmem:[%s6655_s30 + $0xf8] sm:$0xff]   ;;  %1565 = vrot.lane.b32.xlu0 %v5733_v16, %s5263_s19 }
 0x109   : > { %v4817_v50 = vld [vmem:[%s6655_s30 + $0x30] sm:$0xff]   ;;  %v4821_v54 = vld [vmem:[%s6655_s30 + $0x38] sm:$0xff]   ;;  %v1063_v60 = vld [vmem:[%s5660_s11] sm:$0xff] }
 0x10a   : > { %v4818_v51 = vld [vmem:[%s6655_s30 + $0xb0] sm:$0xff]   ;;  %v4822_v55 = vld [vmem:[%s6655_s30 + $0xb8] sm:$0xff]   ;;  %v1079_v4 = vunpack.c.l.bf16 %v1063_v60  ;;  %v1080_v10 = vunpack.c.h.bf16 %v1063_v60  ;;  %vm5922_vm3 = vmpackc.low %vm1604_vm2, %vm1604_vm2 }
 0x10b   : > { %1567 = vrot.lane.b32.xlu1 %v5749_v20, %s5263_s19  ;;  %v1065_v0 = vld [vmem:[%s5660_s11 + $0x10] sm:$0xff]  ;;  %s5264_s19 = smov 80  }
 0x10c   : > { %4524 = vmatmul.mubr.msk.f32.vlgmr.msra.gmra.mrb[0].mxu0 %vm735_vm0, %v5724_v11  ;;  %v1083_v6 = vunpack.c.l.bf16 %v1065_v0  ;;  %v1082_v11 = vunpack.c.h.bf16 %v1064_v63  ;;  %v1071_v63 = vld [vmem:[%s5660_s11 + $0x40] sm:$0xff] }
 0x10d   : > { %4530 = vmatmul.mubr.msk.f32.vlgmr.msra.gmra.mrb[0].mxu1 %vm735_vm0, %v5727_v12  ;;  %991 = vmatpush1.bf16.msra.mxu0 %v4788_v14  ;;  %v1084_v12 = vunpack.c.h.bf16 %v1065_v0 }
 0x10e   : > { %918 = vmatpush1.bf16.msra.mxu1 %v4785_v13  ;;  %4526 = vmatprep.mubr.msk.f32.mxu0 %vm735_vm0, %v5730_v15  ;;  %v1086_v13 = vunpack.c.h.bf16 %v1066_v1 }
 0x10f   : > { %4532 = vmatprep.mubr.msk.f32.mxu1 %vm735_vm0, %v5733_v16  ;;  %4199 = vmatprep.subr.bf16.mxu1 %v4791_v17 }
 0x110   : > { %4239 = vmatprep.subr.bf16.mxu0 %v4792_v18  ;;  %4527 = vmatmul.mubr.msk.f32.gmra.mrb[2].mxu0 %vm735_vm0, %v5746_v19 }
 0x111   : > { %4533 = vmatmul.mubr.msk.f32.gmra.mrb[2].mxu1 %vm735_vm0, %v5749_v20  ;;  %1022 = vmatprep.mubr.bf16.mxu0 %v5262_v24 }
 0x112   : > { %949 = vmatprep.mubr.bf16.mxu1 %v5262_v24 }
 0x114   : > { %3980 = vmatmul.mubr.msk.bf16.vlgmr.msra.gmra.mrb[4].mxu0 %vm735_vm0, %v877_v21 }
 0x115   : > { %3976 = vmatmul.mubr.msk.bf16.vlgmr.msra.gmra.mrb[4].mxu1 %vm735_vm0, %v877_v21  ;;  %1032 = vmatprep.mubr.bf16.mxu0 %v5262_v24 }
 0x116   : > { %959 = vmatprep.mubr.bf16.mxu1 %v5262_v24  ;;  %4200 = vmatpush3.bf16.msra.mxu1 %v4793_v22 }
 0x117   : > { %4240 = vmatpush3.bf16.msra.mxu0 %v4794_v23  ;;  %4201 = vmatprep.subr.bf16.mxu1 %v4795_v25  ;;  %v1067_v25 = vld [vmem:[%s5660_s11 + $0x20] sm:$0xff] }
 0x118   : > { %4241 = vmatprep.subr.bf16.mxu0 %v4796_v26 }
 0x11a   : > { %4202 = vmatpush3.bf16.msra.mxu1 %v4797_v27 }
 0x11b   : > { %4242 = vmatpush3.bf16.msra.mxu0 %v4798_v28  ;;  %4203 = vmatprep.subr.bf16.mxu1 %v4799_v29 }
 0x11c   : > { %4243 = vmatprep.subr.bf16.mxu0 %v4800_v30  ;;  %3981 = vmatmul.mubr.msk.bf16.gmra.mrb[8].mxu0 %vm735_vm0, %v878_v31  ;;  %v1068_v30 = vld [vmem:[%s5660_s11 + $0x28] sm:$0xff] }
 0x11d   : > { %3977 = vmatmul.mubr.msk.bf16.gmra.mrb[8].mxu1 %vm735_vm0, %v878_v31  ;;  %1042 = vmatprep.mubr.bf16.mxu0 %v5262_v24  ;;  %v1069_v31 = vld [vmem:[%s5660_s11 + $0x30] sm:$0xff] }
 0x11e   : > { %969 = vmatprep.mubr.bf16.mxu1 %v5262_v24  ;;  %4204 = vmatpush3.bf16.msra.mxu1 %v4801_v32  ;;  %v1070_v32 = vld [vmem:[%s5660_s11 + $0x38] sm:$0xff] }
 0x11f   : > { %4244 = vmatpush3.bf16.msra.mxu0 %v4802_v33  ;;  %4205 = vmatprep.subr.bf16.mxu1 %v4803_v34 }
 0x120   : > { %4245 = vmatprep.subr.bf16.mxu0 %v4804_v35 }
 0x122   : > { %4206 = vmatpush3.bf16.msra.mxu1 %v4805_v36 }
 0x123   : > { %4246 = vmatpush3.bf16.msra.mxu0 %v4806_v37  ;;  %4207 = vmatprep.subr.bf16.mxu1 %v4807_v40  ;;  %v1087_v37 = vunpack.c.l.bf16 %v1067_v25  ;;  %v1093_v40 = vunpack.c.l.bf16 %v1070_v32 }
 0x124   : > { %3982 = vmatmul.mubr.msk.bf16.gmra.mrb[12].mxu0 %vm735_vm0, %v879_v38  ;;  %4247 = vmatprep.subr.bf16.mxu0 %v4808_v41 }
 0x125   : > { %3978 = vmatmul.mubr.msk.bf16.gmra.mrb[12].mxu1 %vm735_vm0, %v879_v38  ;;  %1052 = vmatprep.mubr.bf16.mxu0 %v5262_v24  ;;  %v1089_v38 = vunpack.c.l.bf16 %v1068_v30 }
 0x126   : > { %979 = vmatprep.mubr.bf16.mxu1 %v5262_v24  ;;  %4208 = vmatpush3.bf16.msra.mxu1 %v4809_v42 }
 0x127   : > { %4248 = vmatpush3.bf16.msra.mxu0 %v4810_v43  ;;  %4209 = vmatprep.subr.bf16.mxu1 %v4811_v44  ;;  %v1088_v43 = vunpack.c.h.bf16 %v1067_v25  ;;  %v1090_v44 = vunpack.c.h.bf16 %v1068_v30 }
 0x128   : > { %4249 = vmatprep.subr.bf16.mxu0 %v4812_v45  ;;  %v1092_v45 = vunpack.c.h.bf16 %v1069_v31 }
 0x12a   : > { %4210 = vmatpush3.bf16.msra.mxu1 %v4813_v46  ;;  %v1094_v46 = vunpack.c.h.bf16 %v1070_v32 }
 0x12b   : > { %4250 = vmatpush3.bf16.msra.mxu0 %v4814_v47  ;;  %4211 = vmatprep.subr.bf16.mxu1 %v4815_v48 }
 0x12c   : > { %3983 = vmatmul.mubr.msk.bf16.gmra.mrb[16].mxu0 %vm735_vm0, %v880_v39  ;;  %4251 = vmatprep.subr.bf16.mxu0 %v4816_v49 }
 0x12d   : > { %3979 = vmatmul.mubr.msk.bf16.gmra.mrb[16].mxu1 %vm735_vm0, %v880_v39  ;;  %v1091_v39 = vunpack.c.l.bf16 %v1069_v31 }
 0x12e   : > { %4212 = vmatpush3.bf16.msra.mxu1 %v4817_v50 }
 0x12f   : > { %4252 = vmatpush3.bf16.msra.mxu0 %v4818_v51  ;;  %4213 = vmatprep.subr.bf16.mxu1 %v4819_v52 }
 0x130   : > { %4253 = vmatprep.subr.bf16.mxu0 %v4820_v53 }
 0x132   : > { %4214 = vmatpush3.bf16.msra.mxu1 %v4821_v54 }
 0x133   : > { %4254 = vmatpush3.bf16.msra.mxu0 %v4822_v55 }
 0x1df   : > { %v5881_v56 = vpop.f32.mrb[0].mxu0 }
 0x1e0   : > { %v5883_v57 = vpop.f32.mrb[0].mxu1  ;;  %v5885_v58 = vpop.f32.mrb[1].mxu0 }
 0x1e1   : > { %v5887_v59 = vpop.f32.mrb[1].mxu1 }
 0x1e3   : > { %v5890_v61 = vpop.f32.mrb[2].mxu0 }
 0x1e4   : > { %v5892_v62 = vpop.f32.mrb[2].mxu1  ;;  %v5897_v2 = vpop.f32.mrb[3].mxu0 }
 0x1e5   : > { %v5899_v3 = vpop.f32.mrb[3].mxu1 }
 0x1e7   : > { %v1024_v9 = vpop.f32.mrb[4].mxu0 }
 0x1e8   : > { %v951_v8 = vpop.f32.mrb[4].mxu1  ;;  %v1026_v15 = vpop.f32.mrb[5].mxu0  ;;  %v1113_v19 = vmul.f32 %v1081_v5, %v1024_v9 }
 0x1e9   : > { %v953_v14 = vpop.f32.mrb[5].mxu1  ;;  %v1028_v17 = vpop.f32.mrb[6].mxu0  ;;  %v1111_v18 = vmul.f32 %v1079_v4, %v951_v8  ;;  %v1114_v27 = vmul.f32 %v1082_v11, %v1026_v15  ;;  %v1074_v8 = vld [vmem:[%s5660_s11 + $0x58] sm:$0xff] }
 0x1ea   : > { %v955_v16 = vpop.f32.mrb[6].mxu1  ;;  %v1117_v21 = vmul.f32 %v1085_v7, %v1028_v17  ;;  %v1030_v23 = vpop.f32.mrb[7].mxu0  ;;  %v1112_v26 = vmul.f32 %v1080_v10, %v953_v14  ;;  %v1073_v7 = vld [vmem:[%s5660_s11 + $0x50] sm:$0xff] }
 0x1eb   : > { %v1115_v20 = vmul.f32 %v1083_v6, %v955_v16  ;;  %v957_v22 = vpop.f32.mrb[7].mxu1  ;;  %v1118_v29 = vmul.f32 %v1086_v13, %v1030_v23  ;;  %v1072_v6 = vld [vmem:[%s5660_s11 + $0x48] sm:$0xff]  ;;  %v1095_v13 = vunpack.c.l.bf16 %v1071_v63  ;;  %v1099_v15 = vunpack.c.l.bf16 %v1073_v7 }
 0x1ec   : > { %v1116_v28 = vmul.f32 %v1084_v12, %v957_v22  ;;  %v1145_v34 = vpack.c.bf16 %v1117_v21, %v1113_v19  ;;  %v1097_v14 = vunpack.c.l.bf16 %v1072_v6  ;;  %v1101_v16 = vunpack.c.l.bf16 %v1074_v8 }
 0x1ed   : > { %v1143_v33 = vpack.c.bf16 %v1115_v20, %v1111_v18  ;;  %v1146_v36 = vpack.c.bf16 %v1118_v29, %v1114_v27  ;;  %v1096_v19 = vunpack.c.h.bf16 %v1071_v63  ;;  %v1098_v20 = vunpack.c.h.bf16 %v1072_v6 }
 0x1ee   : > { %v1144_v35 = vpack.c.bf16 %v1116_v28, %v1112_v26  ;;  %v1100_v21 = vunpack.c.h.bf16 %v1073_v7  ;;  %v1102_v22 = vunpack.c.h.bf16 %v1074_v8 }
 0x1ef   : > { %v1034_v42 = vpop.f32.mrb[8].mxu0  ;;  %1512 = vmatprep.mubr.bf16.mxu0 %v1146_v36 }
 0x1f0   : > { %v961_v41 = vpop.f32.mrb[8].mxu1  ;;  %1447 = vmatprep.mubr.bf16.mxu1 %v1144_v35  ;;  %v1036_v48 = vpop.f32.mrb[9].mxu0  ;;  %1513 = vmatmul.mubr.bf16.vlgmr.msra.gmra.mrb[20].mxu0 %v1145_v34  ;;  %v1121_v52 = vmul.f32 %v1089_v38, %v1034_v42  ;;  %v1075_v34 = vld [vmem:[%s5660_s11 + $0x60] sm:$0xff] }
 0x1f1   : > { %v963_v47 = vpop.f32.mrb[9].mxu1  ;;  %1448 = vmatmul.mubr.bf16.vlgmr.msra.gmra.mrb[20].mxu1 %v1143_v33  ;;  %v1038_v50 = vpop.f32.mrb[10].mxu0  ;;  %v1119_v51 = vmul.f32 %v1087_v37, %v961_v41  ;;  %v1122_v1 = vmul.f32 %v1090_v44, %v1036_v48  ;;  %v1078_v41 = vld [vmem:[%s5660_s11 + $0x78] sm:$0xff] }
 0x1f2   : > { %v965_v49 = vpop.f32.mrb[10].mxu1  ;;  %v1125_v54 = vmul.f32 %v1093_v40, %v1038_v50  ;;  %v1040_v60 = vpop.f32.mrb[11].mxu0  ;;  %v1120_v0 = vmul.f32 %v1088_v43, %v963_v47  ;;  %v1077_v40 = vld [vmem:[%s5660_s11 + $0x70] sm:$0xff] }
 0x1f3   : > { %v1123_v53 = vmul.f32 %v1091_v39, %v965_v49  ;;  %v967_v55 = vpop.f32.mrb[11].mxu1  ;;  %v1126_v5 = vmul.f32 %v1094_v46, %v1040_v60  ;;  %v1076_v39 = vld [vmem:[%s5660_s11 + $0x68] sm:$0xff]  ;;  %v1103_v46 = vunpack.c.l.bf16 %v1075_v34  ;;  %v1107_v48 = vunpack.c.l.bf16 %v1077_v40  ;;  %s3956_s11 = sshll.u32 %s5374_s25, 3  ;;  %s5265_s25 = smov [#allocation14]  }
 0x1f4   : > { %v1124_v4 = vmul.f32 %v1092_v45, %v967_v55  ;;  %v1149_v10 = vpack.c.bf16 %v1125_v54, %v1121_v52  ;;  %v1105_v47 = vunpack.c.l.bf16 %v1076_v39  ;;  %v1109_v49 = vunpack.c.l.bf16 %v1078_v41  ;;  %p699_p2 = scmp.lt.s32.totalorder %s3956_s11, 31 }
 0x1f5   : > { %v1147_v9 = vpack.c.bf16 %v1123_v53, %v1119_v51  ;;  %v1150_v12 = vpack.c.bf16 %v1126_v5, %v1122_v1  ;;  %v1104_v52 = vunpack.c.h.bf16 %v1075_v34  ;;  %v1106_v53 = vunpack.c.h.bf16 %v1076_v39  ;;  %v5940_v34 = vld [vmem:[#allocation10] sm:$0xff]  ;;  %v5950_v39 = vld [vmem:[#allocation10 + $0x38] sm:$0xff] }
 0x1f6   : > { %v1148_v11 = vpack.c.bf16 %v1124_v4, %v1120_v0  ;;  %v1108_v54 = vunpack.c.h.bf16 %v1077_v40  ;;  %v1110_v55 = vunpack.c.h.bf16 %v1078_v41  ;;  %s6677_s11 = smov (!%p699_p2, %s3956_s11), 31 }
 0x1f7   : > { %v1044_v18 = vpop.f32.mrb[12].mxu0  ;;  %1520 = vmatprep.mubr.bf16.mxu0 %v1150_v12  ;;  %s4185_s6 = sshll.u32 %s6677_s11, 5 }
 0x1f8   : > { %v971_v17 = vpop.f32.mrb[12].mxu1  ;;  %1455 = vmatprep.mubr.bf16.mxu1 %v1148_v11  ;;  %v1046_v25 = vpop.f32.mrb[13].mxu0  ;;  %1521 = vmatmul.mubr.bf16.gmra.mrb[24].mxu0 %v1149_v10  ;;  %v1129_v29 = vmul.f32 %v1097_v14, %v1044_v18  ;;  %v1593_v18 = vld [vmem:[%s6656_s9] sm:$0xff]  ;;  %s6156_s2 = scalar_lea.vmem %s6661_s17, %s4185_s6 }
 0x1f9   : > { %v973_v23 = vpop.f32.mrb[13].mxu1  ;;  %1456 = vmatmul.mubr.bf16.gmra.mrb[24].mxu1 %v1147_v9  ;;  %v1048_v27 = vpop.f32.mrb[14].mxu0  ;;  %v1127_v28 = vmul.f32 %v1095_v13, %v971_v17  ;;  %v1130_v36 = vmul.f32 %v1098_v20, %v1046_v25 }
 0x1fa   : > { %v975_v26 = vpop.f32.mrb[14].mxu1  ;;  %v1133_v31 = vmul.f32 %v1101_v16, %v1048_v27  ;;  %v1050_v33 = vpop.f32.mrb[15].mxu0  ;;  %v1128_v35 = vmul.f32 %v1096_v19, %v973_v23  ;;  %v1594_v19 = vld [vmem:[%s6656_s9 + $0x8] sm:$0xff]  ;;  %v1596_v23 = vld [vmem:[%s6656_s9 + $0x18] sm:$0xff] }
 0x1fb   : > { %v1131_v30 = vmul.f32 %v1099_v15, %v975_v26  ;;  %v977_v32 = vpop.f32.mrb[15].mxu1  ;;  %v1134_v38 = vmul.f32 %v1102_v22, %v1050_v33  ;;  %v4611_v20 = vpack.c.bf16 %v1594_v19, %v1593_v18  ;;  %v1595_v22 = vld [vmem:[%s6656_s9 + $0x10] sm:$0xff]  ;;  %v1751_v26 = vld [vmem:[#allocation10 + $0x8] sm:$0xff] }
 0x1fc   : > { %v1132_v37 = vmul.f32 %v1100_v21, %v977_v32  ;;  %v1153_v43 = vpack.c.bf16 %v1133_v31, %v1129_v29  ;;  %v4617_v25 = vpack.c.bf16 %v1596_v23, %v1595_v22  ;;  %v1755_v27 = vld [vmem:[#allocation10 + $0x28] sm:$0xff] }
 0x1fd   : > { %v1151_v42 = vpack.c.bf16 %v1131_v30, %v1127_v28  ;;  %v1154_v45 = vpack.c.bf16 %v1134_v38, %v1130_v36  ;;  %4613 = vmatprep.subr.msk.bf16.mxu1 %vm5922_vm3, %v4611_v20  ;;  %v4032_v28 = vcombine.high %v1751_v26, %v1755_v27  ;;  %v4031_v29 = vcombine.low %v1751_v26, %v1755_v27  ;;  %v1759_v30 = vld [vmem:[#allocation10 + $0x48] sm:$0xff]  ;;  %v5948_v38 = vld [vmem:[#allocation10 + $0x18] sm:$0xff] }
 0x1fe   : > { %v1152_v44 = vpack.c.bf16 %v1132_v37, %v1128_v35  ;;  %4616 = vmatpush3.bf16.xpose.msk.msra.mxu1 %vm5922_vm3, %v4611_v20  ;;  %v1763_v31 = vld [vmem:[#allocation10 + $0x68] sm:$0xff]  ;;  %v5942_v35 = vld [vmem:[#allocation10 + $0x20] sm:$0xff]  ;;  %v4036_v40 = vcombine.high %v5948_v38, %v5950_v39  ;;  %v4035_v41 = vcombine.low %v5948_v38, %v5950_v39 }
 0x1ff   : > { %v1054_v51 = vpop.f32.mrb[16].mxu0  ;;  %1528 = vmatprep.mubr.bf16.mxu0 %v1154_v45  ;;  %4619 = vmatprep.subr.msk.bf16.mxu1 %vm5922_vm3, %v4617_v25  ;;  %v4040_v32 = vcombine.high %v1759_v30, %v1763_v31  ;;  %v4039_v33 = vcombine.low %v1759_v30, %v1763_v31  ;;  %v4029_v36 = vcombine.low %v5940_v34, %v5942_v35  ;;  %v5959_v45 = vld [vmem:[%s6659_s18] ss:$0 sm:$0xff]  ;;  %s6663_s18 = sld [smem:[#allocation33_spill]] }
 0x200   : > { %v981_v50 = vpop.f32.mrb[16].mxu1  ;;  %1463 = vmatprep.mubr.bf16.mxu1 %v1152_v44  ;;  %v1056_v63 = vpop.f32.mrb[17].mxu0  ;;  %1529 = vmatmul.mubr.bf16.gmra.mrb[28].mxu0 %v1153_v43  ;;  %v1137_v5 = vmul.f32 %v1105_v47, %v1054_v51  ;;  %v4030_v37 = vcombine.high %v5940_v34, %v5942_v35  ;;  %v854_v23 = vadd.f32 %v5890_v61, %v5959_v45 }
 0x201   : > { %v983_v60 = vpop.f32.mrb[17].mxu1  ;;  %1464 = vmatmul.mubr.bf16.gmra.mrb[28].mxu1 %v1151_v42  ;;  %v1058_v1 = vpop.f32.mrb[18].mxu0  ;;  %v1135_v4 = vmul.f32 %v1103_v46, %v981_v50  ;;  %v1138_v11 = vmul.f32 %v1106_v53, %v1056_v63  ;;  %1931 = vmatprep.subr.bf16.mxu0 %v4032_v28  ;;  %v859_v61 = vadd.f32 %v5959_v45, %v5887_v59  ;;  %v5974_v59 = vld [vmem:[#allocation10 + $0x10] sm:$0xff] }
 0x202   : > { %v985_v0 = vpop.f32.mrb[18].mxu1  ;;  %v1141_v7 = vmul.f32 %v1109_v49, %v1058_v1  ;;  %v1060_v9 = vpop.f32.mrb[19].mxu0  ;;  %v1136_v10 = vmul.f32 %v1104_v52, %v983_v60  ;;  %1932 = vmatpush1.bf16.msra.mxu0 %v4031_v29  ;;  %v869_v34 = vadd.f32 %v5959_v45, %v5899_v3  ;;  %v874_v3 = vadd.f32 %v5892_v62, %v5959_v45 }
 0x203   : > { %v1139_v6 = vmul.f32 %v1107_v48, %v985_v0  ;;  %v987_v8 = vpop.f32.mrb[19].mxu1  ;;  %v1142_v13 = vmul.f32 %v1110_v55, %v1060_v9  ;;  %1933 = vmatprep.subr.bf16.mxu0 %v4040_v32  ;;  %v1554_v42 = vpop.permute.xlu0 %1553  ;;  %v844_v0 = vadd.f32 %v5881_v56, %v5959_v45 }
 0x204   : > { %v1140_v12 = vmul.f32 %v1108_v54, %v987_v8  ;;  %v1157_v15 = vpack.c.bf16 %v1141_v7, %v1137_v5  ;;  %v839_v54 = vadd.f32 %v5959_v45, %v5885_v58 }
 0x205   : > { %v1155_v14 = vpack.c.bf16 %v1139_v6, %v1135_v4  ;;  %v1158_v17 = vpack.c.bf16 %v1142_v13, %v1138_v11  ;;  %v1558_v6 = vpop.permute.xlu1 %1557 }
 0x206   : > { %v1156_v16 = vpack.c.bf16 %v1140_v12, %v1136_v10  ;;  %4622 = vmatpush3.bf16.xpose.msk.msra.mxu1 %vm5922_vm3, %v4617_v25  ;;  %1934 = vmatpush1.bf16.msra.mxu0 %v4039_v33 }
 0x207   : > { %1536 = vmatprep.mubr.bf16.mxu0 %v1158_v17  ;;  %1858 = vmatprep.subr.bf16.mxu1 %v4030_v37  ;;  %v1556_v5 = vpop.permute.xlu0 %1555  ;;  %v849_v17 = vadd.f32 %v5959_v45, %v5897_v2 }
 0x208   : > { %1471 = vmatprep.mubr.bf16.mxu1 %v1156_v16  ;;  %1537 = vmatmul.mubr.bf16.gmra.mrb[32].mxu0 %v1157_v15 }
 0x209   : > { %1472 = vmatmul.mubr.bf16.gmra.mrb[32].mxu1 %v1155_v14  ;;  %1963 = vmatprep.mubr.bf16.mxu0 %v5262_v24  ;;  %v1560_v27 = vpop.permute.xlu1 %1559 }
 0x20a   : > { %2077 = vmatprep.subr.bf16.mxu0 %v4036_v40 }
 0x2c3   : > { %v4255_v44 = vpop.f32.mrb[20].mxu0 }
 0x2c4   : > { %v4215_v43 = vpop.f32.mrb[20].mxu1  ;;  %v4256_v47 = vpop.f32.mrb[21].mxu0 }
 0x2c5   : > { %v4216_v46 = vpop.f32.mrb[21].mxu1  ;;  %v4257_v49 = vadd.f32 %v4256_v47, %v4255_v44  ;;  %v4258_v51 = vpop.f32.mrb[22].mxu0  ;;  %v1758_v44 = vld [vmem:[#allocation10 + $0x40] sm:$0xff] }
 0x2c6   : > { %v4217_v48 = vadd.f32 %v4216_v46, %v4215_v43  ;;  %v4218_v50 = vpop.f32.mrb[22].mxu1  ;;  %v4259_v53 = vpop.f32.mrb[23].mxu0  ;;  %v1762_v46 = vld [vmem:[#allocation10 + $0x60] sm:$0xff] }
 0x2c7   : > { %v4219_v52 = vpop.f32.mrb[23].mxu1  ;;  %v4260_v63 = vadd.f32 %v4259_v53, %v4258_v51  ;;  %v1761_v53 = vld [vmem:[#allocation10 + $0x58] sm:$0xff] }
 0x2c8   : > { %v1515_v55 = vadd.f32 %v4257_v49, %v4217_v48  ;;  %v4220_v60 = vadd.f32 %v4219_v52, %v4218_v50 }
 0x2ca   : > { %v1518_v1 = vadd.f32 %v4260_v63, %v4220_v60  ;;  %v1545_v4 = vadd.f32 %v1515_v55, %v839_v54  ;;  %v1765_v54 = vld [vmem:[#allocation10 + $0x78] sm:$0xff]  ;;  %v1562_v55 = vpop.permute.xlu0 %1561  ;;  %v4038_v60 = vcombine.high %v1758_v44, %v1762_v46 }
 0x2cb   : > { %v4261_v9 = vpop.f32.mrb[24].mxu0 }
 0x2cc   : > { %v1577_v7 = vadd.f32 %v1554_v42, %v1545_v4  ;;  %v4221_v8 = vpop.f32.mrb[24].mxu1  ;;  %v1546_v10 = vadd.f32 %v1518_v1, %v844_v0  ;;  %v4262_v12 = vpop.f32.mrb[25].mxu0  ;;  %v864_v0 = vadd.f32 %v5883_v57, %v5959_v45  ;;  %v4037_v57 = vcombine.low %v1758_v44, %v1762_v46 }
 0x2cd   : > { %v4222_v11 = vpop.f32.mrb[25].mxu1  ;;  %v4263_v58 = vadd.f32 %v4262_v12, %v4261_v9  ;;  %v4264_v16 = vpop.f32.mrb[26].mxu0 }
 0x2ce   : > { %4909 = vtanh.f32 %v1577_v7  ;;  %v1578_v13 = vadd.f32 %v1556_v5, %v1546_v10  ;;  %v4223_v14 = vadd.f32 %v4222_v11, %v4221_v8  ;;  %v4224_v15 = vpop.f32.mrb[26].mxu1  ;;  %v4265_v18 = vpop.f32.mrb[27].mxu0  ;;  %v5976_v5 = vld [vmem:[#allocation10 + $0x30] sm:$0xff]  ;;  %v4044_v8 = vcombine.high %v1761_v53, %v1765_v54 }
 0x2cf   : > { %v4225_v56 = vpop.f32.mrb[27].mxu1  ;;  %v4266_v22 = vadd.f32 %v4265_v18, %v4264_v16  ;;  %v1564_v7 = vpop.permute.xlu1 %1563  ;;  %v4033_v44 = vcombine.low %v5974_v59, %v5976_v5 }
 0x2d0   : > { %4911 = vtanh.f32 %v1578_v13  ;;  %v1523_v19 = vadd.f32 %v4263_v58, %v4223_v14  ;;  %v4226_v20 = vadd.f32 %v4225_v56, %v4224_v15  ;;  %v4034_v58 = vcombine.high %v5974_v59, %v5976_v5  ;;  %v1566_v38 = vpop.permute.xlu0 %1565  ;;  %v4838_v59 = vld [vmem:[%s6660_s8] sm:$0xff]   ;;  %v4839_v5 = vld [vmem:[%s6660_s8 + $0xf8] sm:$0xff]  }
 0x2d1   : > { %v4043_v15 = vcombine.low %v1761_v53, %v1765_v54  ;;  %v4830_v53 = vld [vmem:[%s6660_s8 + $0x98] sm:$0xff]   ;;  %v4831_v54 = vld [vmem:[%s6660_s8 + $0xe0] sm:$0xff]  }
 0x2d2   : > { %v1526_v25 = vadd.f32 %v4266_v22, %v4226_v20  ;;  %v1547_v26 = vadd.f32 %v1523_v19, %v849_v17  ;;  %v4823_v20 = vld [vmem:[%s6660_s8 + $0xc0] sm:$0xff]  }
 0x2d3   : > { %v4267_v30 = vpop.f32.mrb[28].mxu0 }
 0x2d4   : > { %v1579_v28 = vadd.f32 %v1558_v6, %v1547_v26  ;;  %v4227_v29 = vpop.f32.mrb[28].mxu1  ;;  %v1548_v31 = vadd.f32 %v1526_v25, %v854_v23  ;;  %v4268_v33 = vpop.f32.mrb[29].mxu0 }
 0x2d5   : > { %v4228_v32 = vpop.f32.mrb[29].mxu1  ;;  %v4269_v40 = vadd.f32 %v4268_v33, %v4267_v30  ;;  %v4270_v43 = vpop.f32.mrb[30].mxu0 }
 0x2d6   : > { %4913 = vtanh.f32 %v1579_v28  ;;  %v1580_v2 = vadd.f32 %v1560_v27, %v1548_v31  ;;  %v4229_v37 = vadd.f32 %v4228_v32, %v4227_v29  ;;  %v4230_v42 = vpop.f32.mrb[30].mxu1  ;;  %v4271_v48 = vpop.f32.mrb[31].mxu0 }
 0x2d7   : > { %v4231_v47 = vpop.f32.mrb[31].mxu1  ;;  %v4272_v52 = vadd.f32 %v4271_v48, %v4270_v43  ;;  %v1568_v28 = vpop.permute.xlu1 %1567  ;;  %v4825_v48 = vld [vmem:[%s6660_s8 + $0xc8] sm:$0xff]  }
 0x2d8   : > { %v4910_v49 = vpop.eup %4909  ;;  %4915 = vtanh.f32 %v1580_v2  ;;  %v1531_v50 = vadd.f32 %v4269_v40, %v4229_v37  ;;  %v4232_v51 = vadd.f32 %v4231_v47, %v4230_v42  ;;  %v1760_v40 = vld [vmem:[#allocation10 + $0x50] sm:$0xff]  ;;  %v4824_v47 = vld [vmem:[%s6660_s8 + $0x80] sm:$0xff]  }
 0x2d9   : > { %4543 = vmatprep.mubr.msk.f32.mxu1 %vm1604_vm2, %v4910_v49  ;;  %v1764_v42 = vld [vmem:[#allocation10 + $0x70] sm:$0xff] }
 0x2da   : > { %v4912_v63 = vpop.eup %4911  ;;  %v1534_v1 = vadd.f32 %v4272_v52, %v4232_v51  ;;  %v1549_v4 = vadd.f32 %v1531_v50, %v859_v61  ;;  %v4042_v46 = vcombine.high %v1760_v40, %v1764_v42  ;;  %v4041_v61 = vcombine.low %v1760_v40, %v1764_v42  ;;  %v4827_v50 = vld [vmem:[%s6660_s8 + $0xd0] sm:$0xff]   ;;  %v4829_v52 = vld [vmem:[%s6660_s8 + $0xd8] sm:$0xff]   ;;  %v2159_v42 = vld [vmem:[%s6156_s2 + $0x48] sm:$0xff] }
 0x2db   : > { %v5978_v6 = vpack.c.bf16 %v4912_v63, %v4910_v49  ;;  %4544 = vmatmul.mubr.msk.f32.vlgmr.msra.gmra.mrb[36].mxu1 %vm1604_vm2, %v4912_v63  ;;  %v4273_v11 = vpop.f32.mrb[32].mxu0  ;;  %v4826_v49 = vld [vmem:[%s6660_s8 + $0x88] sm:$0xff]   ;;  %v4828_v51 = vld [vmem:[%s6660_s8 + $0x90] sm:$0xff]  }
 0x2dc   : > { %v1581_v9 = vadd.f32 %v1562_v55, %v1549_v4  ;;  %v4233_v10 = vpop.f32.mrb[32].mxu1  ;;  %v1550_v12 = vadd.f32 %v1534_v1, %v864_v0  ;;  %1859 = vmatpush1.bf16.msra.mxu1 %v4029_v36  ;;  %v4274_v14 = vpop.f32.mrb[33].mxu0  ;;  %v4832_v55 = vld [vmem:[%s6660_s8 + $0xa0] sm:$0xff]   ;;  %v4834_v63 = vld [vmem:[%s6660_s8 + $0xa8] sm:$0xff]   ;;  %v4835_v0 = vld [vmem:[%s6660_s8 + $0xf0] sm:$0xff]  }
 0x2dd   : > { %v4234_v13 = vpop.f32.mrb[33].mxu1  ;;  %4049 = vmatmul.mubr.msk.bf16.vlgmr.msra.gmra.mrb[36].mxu0 %vm1604_vm2, %v5978_v6  ;;  %1860 = vmatprep.subr.bf16.mxu1 %v4038_v60  ;;  %v4275_v56 = vadd.f32 %v4274_v14, %v4273_v11  ;;  %v4276_v19 = vpop.f32.mrb[34].mxu0  ;;  %v4833_v60 = vld [vmem:[%s6660_s8 + $0xe8] sm:$0xff]   ;;  %v4836_v1 = vld [vmem:[%s6660_s8 + $0xb0] sm:$0xff]   ;;  %v4837_v4 = vld [vmem:[%s6660_s8 + $0x40] sm:$0xff]  }
 0x2de   : > { %4917 = vtanh.f32 %v1581_v9  ;;  %v1582_v16 = vadd.f32 %v1564_v7, %v1550_v12  ;;  %v4235_v17 = vadd.f32 %v4234_v13, %v4233_v10  ;;  %v4236_v18 = vpop.f32.mrb[34].mxu1  ;;  %1973 = vmatprep.mubr.bf16.mxu0 %v5262_v24  ;;  %2078 = vmatpush1.bf16.msra.mxu0 %v4035_v41  ;;  %v4277_v36 = vpop.f32.mrb[35].mxu0  ;;  %v4841_v7 = vld [vmem:[%s6660_s8 + $0x48] sm:$0xff]   ;;  %v4843_v9 = vld [vmem:[%s6660_s8 + $0x1c0] sm:$0xff]   ;;  %v4845_v10 = vld [vmem:[%s6660_s8 + $0x50] sm:$0xff]  }
 0x2df   : > { %v4237_v35 = vpop.f32.mrb[35].mxu1  ;;  %2079 = vmatprep.subr.bf16.mxu0 %v4044_v8  ;;  %v4278_v26 = vadd.f32 %v4277_v36, %v4276_v19  ;;  %v4842_v8 = vld [vmem:[%s6660_s8 + $0x8] sm:$0xff]   ;;  %v4846_v11 = vld [vmem:[%s6660_s8 + $0x10] sm:$0xff]   ;;  %v4849_v12 = vld [vmem:[%s6660_s8 + $0x58] sm:$0xff]  }
 0x2e0   : > { %v4914_v22 = vpop.eup %4913  ;;  %4919 = vtanh.f32 %v1582_v16  ;;  %v1539_v23 = vadd.f32 %v4275_v56, %v4235_v17  ;;  %v4238_v25 = vadd.f32 %v4237_v35, %v4236_v18  ;;  %1861 = vmatpush1.bf16.msra.mxu1 %v4037_v57  ;;  %v4850_v57 = vld [vmem:[%s6660_s8 + $0x18] sm:$0xff]   ;;  %v4853_v13 = vld [vmem:[%s6660_s8 + $0x60] sm:$0xff]   ;;  %v4861_v16 = vld [vmem:[%s6660_s8 + $0x70] sm:$0xff]  }
 0x2e1   : > { %4546 = vmatprep.mubr.msk.f32.mxu1 %vm1604_vm2, %v4914_v22  ;;  %2004 = vmatprep.subr.bf16.mxu1 %v4034_v58  ;;  %v4854_v14 = vld [vmem:[%s6660_s8 + $0x20] sm:$0xff]   ;;  %v4857_v58 = vld [vmem:[%s6660_s8 + $0x68] sm:$0xff]   ;;  %v4862_v17 = vld [vmem:[%s6660_s8 + $0x30] sm:$0xff]  }
 0x2e2   : > { %v4916_v39 = vpop.eup %4915  ;;  %v1542_v41 = vadd.f32 %v4278_v26, %v4238_v25  ;;  %v1551_v27 = vadd.f32 %v1539_v23, %v869_v34  ;;  %2080 = vmatpush1.bf16.msra.mxu0 %v4043_v15  ;;  %v4858_v15 = vld [vmem:[%s6660_s8 + $0x28] sm:$0xff]   ;;  %v4865_v56 = vld [vmem:[%s6660_s8 + $0x78] sm:$0xff]   ;;  %v4869_v19 = vld [vmem:[%s6660_s8 + $0x140] sm:$0xff]  }
 0x2e3   : > { %4547 = vmatmul.mubr.msk.f32.gmra.mrb[38].mxu1 %vm1604_vm2, %v4916_v39  ;;  %v6001_v29 = vpack.c.bf16 %v4916_v39, %v4914_v22  ;;  %4331 = vmatprep.subr.bf16.mxu0 %v4823_v20  ;;  %v4866_v18 = vld [vmem:[%s6660_s8 + $0x38] sm:$0xff]   ;;  %v4957_v34 = vld [vmem:[%s5653_s26] sm:$0xff]  ;;  %v4958_v35 = vld [vmem:[%s5653_s26 + $0x10] sm:$0xff] }
 0x2e4   : > { %v1583_v30 = vadd.f32 %v1566_v38, %v1551_v27  ;;  %v1552_v31 = vadd.f32 %v1542_v41, %v874_v3  ;;  %3122 = vrot.lane.b32.xlu0 %v4957_v34, %s5264_s19  ;;  %3124 = vrot.lane.b32.xlu1 %v4958_v35, %s5264_s19  ;;  %v4959_v36 = vld [vmem:[%s5653_s26 + $0x20] sm:$0xff]  ;;  %v4960_v20 = vld [vmem:[%s5653_s26 + $0x30] sm:$0xff] }
 0x2e5   : > { %4050 = vmatmul.mubr.msk.bf16.gmra.mrb[40].mxu0 %vm1604_vm2, %v6001_v29  ;;  %v4961_v22 = vld [vmem:[%s5653_s26 + $0x40] sm:$0xff]  ;;  %v4962_v23 = vld [vmem:[%s5653_s26 + $0x50] sm:$0xff]  ;;  %v2151_v38 = vld [vmem:[%s6156_s2 + $0x8] sm:$0xff] }
 0x2e6   : > { %4921 = vtanh.f32 %v1583_v30  ;;  %v1584_v32 = vadd.f32 %v1568_v28, %v1552_v31  ;;  %1983 = vmatprep.mubr.bf16.mxu0 %v5262_v24  ;;  %v4963_v25 = vld [vmem:[%s5653_s26 + $0x60] sm:$0xff]  ;;  %v4964_v26 = vld [vmem:[%s5653_s26 + $0x70] sm:$0xff]  ;;  %v2155_v39 = vld [vmem:[%s6156_s2 + $0x28] sm:$0xff]  ;;  %v2184_v27 = vunpack.c.l.bf16 %v2151_v38  ;;  %v2185_v30 = vunpack.c.h.bf16 %v2151_v38 }
 0x2e7   : > { %v2192_v28 = vunpack.c.l.bf16 %v2155_v39  ;;  %v2193_v31 = vunpack.c.h.bf16 %v2155_v39 }
 0x2e8   : > { %v4918_v33 = vpop.eup %4917  ;;  %4923 = vtanh.f32 %v1584_v32  ;;  %3126 = vrot.lane.b32.xlu0 %v4959_v36, %s5264_s19  ;;  %3128 = vrot.lane.b32.xlu1 %v4960_v20, %s5264_s19  ;;  %v4859_v20 = vld [vmem:[%s6660_s8 + $0x1e0] sm:$0xff]  }
 0x2e9   : > { %4549 = vmatprep.mubr.msk.f32.mxu1 %vm1604_vm2, %v4918_v33 }
 0x2ea   : > { %v4920_v62 = vpop.eup %4919 }
 0x2eb   : > { %4550 = vmatmul.mubr.msk.f32.gmra.mrb[40].mxu1 %vm1604_vm2, %v4920_v62  ;;  %v1748_v45 = vpack.c.bf16 %v4920_v62, %v4918_v33 }
 0x2ec   : > { %3130 = vrot.lane.b32.xlu0 %v4961_v22, %s5264_s19  ;;  %3132 = vrot.lane.b32.xlu1 %v4962_v23, %s5264_s19 }
 0x2ed   : > { %4051 = vmatmul.mubr.msk.bf16.gmra.mrb[44].mxu0 %vm1604_vm2, %v1748_v45 }
 0x2ee   : > { %1993 = vmatprep.mubr.bf16.mxu0 %v5262_v24 }
 0x2f0   : > { %v4922_v2 = vpop.eup %4921  ;;  %3134 = vrot.lane.b32.xlu0 %v4963_v25, %s5264_s19  ;;  %3136 = vrot.lane.b32.xlu1 %v4964_v26, %s5264_s19  ;;  %v2175_v25 = vld [vmem:[%s6156_s2 + $0xc8] sm:$0xff]  ;;  %s3762_s19 = sshll.u32 %s6485_s21, 4  ;;  %s6510_s19 = int_to_ptr.vmem [resolvable:$true] %s3762_s19 }
 0x2f1   : > { %4552 = vmatprep.mubr.msk.f32.mxu1 %vm1604_vm2, %v4922_v2  ;;  %v2179_v26 = vld [vmem:[%s6156_s2 + $0xe8] sm:$0xff]  ;;  %s5167_s17 = scalar_lea.vmem %s6510_s19, 1024 }
 0x2f2   : > { %v4924_v37 = vpop.eup %4923  ;;  %p5168_p5 = scmp.ne.s32.totalorder %s6510_s19, %s5167_s17 }
 0x2f3   : > { %4553 = vmatmul.mubr.msk.f32.gmra.mrb[42].mxu1 %vm1604_vm2, %v4924_v37  ;;  %v1749_v43 = vpack.c.bf16 %v4924_v37, %v4922_v2 }
 0x2f4   : > { %1890 = vmatprep.mubr.bf16.mxu1 %v5262_v24  ;;  %p5169_p11 = pnand %p5168_p5, %p6667_p10 }
 0x2f5   : > { %4052 = vmatmul.mubr.msk.bf16.gmra.mrb[48].mxu0 %vm1604_vm2, %v1749_v43 }
 0x2f6   : > { %2109 = vmatprep.mubr.bf16.mxu0 %v5262_v24  ;;  %p5170_p9 = pneg %p5169_p11 }
 0x2f7   : > { %4045 = vmatmul.mubr.msk.bf16.vlgmr.msra.gmra.mrb[44].mxu1 %vm1604_vm2, %v5978_v6 }
 0x2f8   : > { %2005 = vmatpush1.bf16.msra.mxu1 %v4033_v44  ;;  %1900 = vmatprep.mubr.bf16.mxu1 %v5262_v24 }
 0x2f9   : > { %2006 = vmatprep.subr.bf16.mxu1 %v4042_v46 }
 0x2fc   : > { %2007 = vmatpush1.bf16.msra.mxu1 %v4041_v61 }
 0x2fd   : > { %4057 = vmatmul.mubr.msk.bf16.vlgmr.msra.gmra.mrb[52].mxu0 %vm1604_vm2, %v5978_v6  ;;  %4291 = vmatprep.subr.bf16.mxu1 %v4837_v4 }
 0x2fe   : > { %2119 = vmatprep.mubr.bf16.mxu0 %v5262_v24  ;;  %4332 = vmatpush3.bf16.msra.mxu0 %v4824_v47  ;;  %v4844_v47 = vld [vmem:[%s6660_s8 + $0x180] sm:$0xff]  }
 0x2ff   : > { %4046 = vmatmul.mubr.msk.bf16.gmra.mrb[48].mxu1 %vm1604_vm2, %v6001_v29  ;;  %4333 = vmatprep.subr.bf16.mxu0 %v4825_v48 }
 0x300   : > { %1910 = vmatprep.mubr.bf16.mxu1 %v5262_v24 }
 0x302   : > { %4334 = vmatpush3.bf16.msra.mxu0 %v4826_v49  ;;  %v2200_v49 = vunpack.c.l.bf16 %v2159_v42 }
 0x303   : > { %4335 = vmatprep.subr.bf16.mxu0 %v4827_v50 }
 0x305   : > { %4058 = vmatmul.mubr.msk.bf16.gmra.mrb[56].mxu0 %vm1604_vm2, %v6001_v29 }
 0x306   : > { %2129 = vmatprep.mubr.bf16.mxu0 %v5262_v24  ;;  %4336 = vmatpush3.bf16.msra.mxu0 %v4828_v51  ;;  %v4847_v51 = vld [vmem:[%s6660_s8 + $0x1c8] sm:$0xff]  }
 0x307   : > { %4047 = vmatmul.mubr.msk.bf16.gmra.mrb[52].mxu1 %vm1604_vm2, %v1748_v45  ;;  %4337 = vmatprep.subr.bf16.mxu0 %v4829_v52 }
 0x308   : > { %1920 = vmatprep.mubr.bf16.mxu1 %v5262_v24 }
 0x30a   : > { %4338 = vmatpush3.bf16.msra.mxu0 %v4830_v53  ;;  %v2201_v53 = vunpack.c.h.bf16 %v2159_v42 }
 0x30b   : > { %4339 = vmatprep.subr.bf16.mxu0 %v4831_v54 }
 0x30d   : > { %4059 = vmatmul.mubr.msk.bf16.gmra.mrb[60].mxu0 %vm1604_vm2, %v1748_v45 }
 0x30e   : > { %2139 = vmatprep.mubr.bf16.mxu0 %v5262_v24  ;;  %4340 = vmatpush3.bf16.msra.mxu0 %v4832_v55 }
 0x30f   : > { %4048 = vmatmul.mubr.msk.bf16.gmra.mrb[56].mxu1 %vm1604_vm2, %v1749_v43  ;;  %4341 = vmatprep.subr.bf16.mxu0 %v4833_v60 }
 0x310   : > { %2036 = vmatprep.mubr.bf16.mxu1 %v5262_v24 }
 0x312   : > { %4342 = vmatpush3.bf16.msra.mxu0 %v4834_v63  ;;  %v4848_v63 = vld [vmem:[%s6660_s8 + $0x188] sm:$0xff]  }
 0x313   : > { %4343 = vmatprep.subr.bf16.mxu0 %v4835_v0 }
 0x315   : > { %4060 = vmatmul.mubr.msk.bf16.gmra.mrb[64].mxu0 %vm1604_vm2, %v1749_v43 }
 0x316   : > { %4344 = vmatpush3.bf16.msra.mxu0 %v4836_v1 }
 0x317   : > { %4053 = vmatmul.mubr.msk.bf16.vlgmr.msra.gmra.mrb[60].mxu1 %vm1604_vm2, %v5978_v6  ;;  %v4840_v6 = vld [vmem:[%s6660_s8 + $0xb8] sm:$0xff]   ;;  %4345 = vmatprep.subr.bf16.mxu0 %v4839_v5 }
 0x318   : > { %2046 = vmatprep.mubr.bf16.mxu1 %v5262_v24  ;;  %4292 = vmatpush3.bf16.msra.mxu1 %v4838_v59  ;;  %v4851_v59 = vld [vmem:[%s6660_s8 + $0x1d0] sm:$0xff]  }
 0x319   : > { %4293 = vmatprep.subr.bf16.mxu1 %v4841_v7  ;;  %v2167_v7 = vld [vmem:[%s6156_s2 + $0x88] sm:$0xff] }
 0x31a   : > { %4346 = vmatpush3.bf16.msra.mxu0 %v4840_v6 }
 0x31b   : > { %4411 = vmatprep.subr.bf16.mxu0 %v4843_v9 }
 0x31c   : > { %4294 = vmatpush3.bf16.msra.mxu1 %v4842_v8  ;;  %v2171_v8 = vld [vmem:[%s6156_s2 + $0xa8] sm:$0xff] }
 0x31d   : > { %4295 = vmatprep.subr.bf16.mxu1 %v4845_v10 }
 0x31f   : > { %4054 = vmatmul.mubr.msk.bf16.gmra.mrb[64].mxu1 %vm1604_vm2, %v6001_v29 }
 0x320   : > { %2056 = vmatprep.mubr.bf16.mxu1 %v5262_v24  ;;  %4296 = vmatpush3.bf16.msra.mxu1 %v4846_v11 }
 0x321   : > { %4297 = vmatprep.subr.bf16.mxu1 %v4849_v12  ;;  %v4852_v12 = vld [vmem:[%s6660_s8 + $0x190] sm:$0xff]  }
 0x324   : > { %4298 = vmatpush3.bf16.msra.mxu1 %v4850_v57 }
 0x325   : > { %4299 = vmatprep.subr.bf16.mxu1 %v4853_v13  ;;  %v2216_v13 = vunpack.c.l.bf16 %v2167_v7 }
 0x327   : > { %4055 = vmatmul.mubr.msk.bf16.gmra.mrb[68].mxu1 %vm1604_vm2, %v1748_v45 }
 0x328   : > { %2066 = vmatprep.mubr.bf16.mxu1 %v5262_v24  ;;  %4300 = vmatpush3.bf16.msra.mxu1 %v4854_v14  ;;  %v2224_v14 = vunpack.c.l.bf16 %v2171_v8 }
 0x329   : > { %4301 = vmatprep.subr.bf16.mxu1 %v4857_v58  ;;  %v4855_v58 = vld [vmem:[%s6660_s8 + $0x1d8] sm:$0xff]  }
 0x32c   : > { %4302 = vmatpush3.bf16.msra.mxu1 %v4858_v15 }
 0x32d   : > { %4303 = vmatprep.subr.bf16.mxu1 %v4861_v16  ;;  %v2217_v16 = vunpack.c.h.bf16 %v2167_v7 }
 0x32f   : > { %4056 = vmatmul.mubr.msk.bf16.gmra.mrb[72].mxu1 %vm1604_vm2, %v1749_v43  ;;  %v2163_v43 = vld [vmem:[%s6156_s2 + $0x68] sm:$0xff] }
 0x330   : > { %4304 = vmatpush3.bf16.msra.mxu1 %v4862_v17  ;;  %v2208_v50 = vunpack.c.l.bf16 %v2163_v43  ;;  %v2209_v54 = vunpack.c.h.bf16 %v2163_v43  ;;  %v2225_v17 = vunpack.c.h.bf16 %v2171_v8 }
 0x331   : > { %4305 = vmatprep.subr.bf16.mxu1 %v4865_v56 }
 0x334   : > { %4306 = vmatpush3.bf16.msra.mxu1 %v4866_v18 }
 0x335   : > { %4371 = vmatprep.subr.bf16.mxu1 %v4869_v19  ;;  %v4856_v19 = vld [vmem:[%s6660_s8 + $0x198] sm:$0xff]  }
 0x3ae   : > { %v6160_v3 = vpop.f32.mrb[36].mxu1 }
 0x3af   : > { %v6162_v41 = vpop.f32.mrb[37].mxu1 }
 0x3b0   : > { %v1965_v29 = vpop.f32.mrb[36].mxu0 }
 0x3b1   : > { %v1967_v32 = vpop.f32.mrb[37].mxu0  ;;  %v2248_v62 = vmul.f32 %v2184_v27, %v1965_v29  ;;  %v4860_v29 = vld [vmem:[%s6660_s8 + $0x1a0] sm:$0xff]  }
 0x3b2   : > { %v1969_v33 = vpop.f32.mrb[38].mxu0  ;;  %v2249_v37 = vmul.f32 %v2185_v30, %v1967_v32  ;;  %v2154_v30 = vld [vmem:[%s6156_s2 + $0x20] sm:$0xff]  ;;  %v2232_v32 = vunpack.c.l.bf16 %v2175_v25 }
 0x3b3   : > { %v2256_v45 = vmul.f32 %v2192_v28, %v1969_v33  ;;  %v1971_v2 = vpop.f32.mrb[39].mxu0  ;;  %v2150_v28 = vld [vmem:[%s6156_s2] sm:$0xff]  ;;  %v2240_v33 = vunpack.c.l.bf16 %v2179_v26  ;;  %v2190_v43 = vunpack.c.l.bf16 %v2154_v30 }
 0x3b4   : > { %v2257_v40 = vmul.f32 %v2193_v31, %v1971_v2  ;;  %v2233_v2 = vunpack.c.h.bf16 %v2175_v25  ;;  %v2182_v42 = vunpack.c.l.bf16 %v2150_v28 }
 0x3b5   : > { %v2312_v44 = vpack.c.bf16 %v2256_v45, %v2248_v62  ;;  %v4863_v62 = vld [vmem:[%s6660_s8 + $0x1e8] sm:$0xff]  }
 0x3b6   : > { %v2313_v46 = vpack.c.bf16 %v2257_v40, %v2249_v37  ;;  %v6166_v61 = vpop.f32.mrb[38].mxu1  ;;  %v2241_v37 = vunpack.c.h.bf16 %v2179_v26 }
 0x3b7   : > { %v6171_v48 = vpop.f32.mrb[39].mxu1 }
 0x3b8   : > { %v1975_v52 = vpop.f32.mrb[40].mxu0  ;;  %2951 = vmatprep.mubr.bf16.mxu0 %v2313_v46 }
 0x3b9   : > { %v1977_v55 = vpop.f32.mrb[41].mxu0  ;;  %2952 = vmatmul.mubr.bf16.vlgmr.msra.gmra.mrb[68].mxu0 %v2312_v44  ;;  %v2264_v0 = vmul.f32 %v2200_v49, %v1975_v52  ;;  %v2191_v49 = vunpack.c.h.bf16 %v2154_v30 }
 0x3ba   : > { %v1979_v60 = vpop.f32.mrb[42].mxu0  ;;  %4412 = vmatpush3.bf16.msra.mxu0 %v4844_v47  ;;  %v2265_v5 = vmul.f32 %v2201_v53, %v1977_v55  ;;  %v2183_v47 = vunpack.c.h.bf16 %v2150_v28  ;;  %v4867_v55 = vld [vmem:[%s6660_s8 + $0x1f0] sm:$0xff]   ;;  %v4872_v28 = vld [vmem:[%s6660_s8 + $0x1b8] sm:$0xff]  }
 0x3bb   : > { %v2272_v1 = vmul.f32 %v2208_v50, %v1979_v60  ;;  %v1981_v4 = vpop.f32.mrb[43].mxu0  ;;  %4413 = vmatprep.subr.bf16.mxu0 %v4847_v51  ;;  %v4864_v50 = vld [vmem:[%s6660_s8 + $0x1a8] sm:$0xff]  }
 0x3bc   : > { %v2273_v6 = vmul.f32 %v2209_v54, %v1981_v4  ;;  %v2157_v4 = vld [vmem:[%s6156_s2 + $0x38] sm:$0xff] }
 0x3bd   : > { %v2320_v9 = vpack.c.bf16 %v2272_v1, %v2264_v0  ;;  %v2153_v1 = vld [vmem:[%s6156_s2 + $0x18] sm:$0xff] }
 0x3be   : > { %v2321_v10 = vpack.c.bf16 %v2273_v6, %v2265_v5  ;;  %v6184_v11 = vpop.f32.mrb[40].mxu1  ;;  %4414 = vmatpush3.bf16.msra.mxu0 %v4848_v63 }
 0x3bf   : > { %v6189_v57 = vpop.f32.mrb[41].mxu1  ;;  %4415 = vmatprep.subr.bf16.mxu0 %v4851_v59 }
 0x3c0   : > { %v1985_v15 = vpop.f32.mrb[44].mxu0  ;;  %2959 = vmatprep.mubr.bf16.mxu0 %v2321_v10 }
 0x3c1   : > { %v1987_v56 = vpop.f32.mrb[45].mxu0  ;;  %2960 = vmatmul.mubr.bf16.gmra.mrb[72].mxu0 %v2320_v9  ;;  %v2280_v34 = vmul.f32 %v2216_v13, %v1985_v15  ;;  %v4868_v13 = vld [vmem:[%s6660_s8 + $0x1b0] sm:$0xff]   ;;  %v2188_v15 = vunpack.c.l.bf16 %v2153_v1 }
 0x3c2   : > { %v1989_v18 = vpop.f32.mrb[46].mxu0  ;;  %4416 = vmatpush3.bf16.msra.mxu0 %v4852_v12  ;;  %v2281_v22 = vmul.f32 %v2217_v16, %v1987_v56  ;;  %v2158_v12 = vld [vmem:[%s6156_s2 + $0x40] sm:$0xff]  ;;  %v2196_v16 = vunpack.c.l.bf16 %v2157_v4 }
 0x3c3   : > { %v2288_v35 = vmul.f32 %v2224_v14, %v1989_v18  ;;  %v1991_v36 = vpop.f32.mrb[47].mxu0  ;;  %4417 = vmatprep.subr.bf16.mxu0 %v4855_v58  ;;  %v2162_v14 = vld [vmem:[%s6156_s2 + $0x60] sm:$0xff] }
 0x3c4   : > { %v2289_v23 = vmul.f32 %v2225_v17, %v1991_v36  ;;  %v4871_v17 = vld [vmem:[%s6660_s8 + $0x1f8] sm:$0xff]  }
 0x3c5   : > { %v2328_v38 = vpack.c.bf16 %v2288_v35, %v2280_v34  ;;  %v2197_v34 = vunpack.c.h.bf16 %v2157_v4  ;;  %v4870_v35 = vld [vmem:[%s6660_s8 + $0x100] sm:$0xff]  }
 0x3c6   : > { %v2329_v39 = vpack.c.bf16 %v2289_v23, %v2281_v22  ;;  %v6202_v27 = vpop.f32.mrb[42].mxu1  ;;  %4418 = vmatpush3.bf16.msra.mxu0 %v4856_v19  ;;  %v2189_v19 = vunpack.c.h.bf16 %v2153_v1  ;;  %v2206_v22 = vunpack.c.l.bf16 %v2162_v14  ;;  %v4873_v23 = vld [vmem:[%s6660_s8 + $0x148] sm:$0xff]  }
 0x3c7   : > { %v6209_v31 = vpop.f32.mrb[43].mxu1  ;;  %4419 = vmatprep.subr.bf16.mxu0 %v4859_v20  ;;  %v2198_v20 = vunpack.c.l.bf16 %v2158_v12 }
 0x3c8   : > { %v1995_v45 = vpop.f32.mrb[48].mxu0  ;;  %2967 = vmatprep.mubr.bf16.mxu0 %v2329_v39  ;;  %v2207_v39 = vunpack.c.h.bf16 %v2162_v14 }
 0x3c9   : > { %v1997_v40 = vpop.f32.mrb[49].mxu0  ;;  %2968 = vmatmul.mubr.bf16.gmra.mrb[76].mxu0 %v2328_v38  ;;  %v2296_v51 = vmul.f32 %v2232_v32, %v1995_v45  ;;  %v2199_v38 = vunpack.c.h.bf16 %v2158_v12 }
 0x3ca   : > { %v1892_v44 = vpop.f32.mrb[44].mxu1  ;;  %v1999_v46 = vpop.f32.mrb[50].mxu0  ;;  %4420 = vmatpush3.bf16.msra.mxu0 %v4860_v29  ;;  %v2297_v60 = vmul.f32 %v2233_v2, %v1997_v40  ;;  %v4874_v40 = vld [vmem:[%s6660_s8 + $0x108] sm:$0xff]  }
 0x3cb   : > { %v2304_v52 = vmul.f32 %v2240_v33, %v1999_v46  ;;  %v1894_v53 = vpop.f32.mrb[45].mxu1  ;;  %v2001_v54 = vpop.f32.mrb[51].mxu0  ;;  %4421 = vmatprep.subr.bf16.mxu0 %v4863_v62  ;;  %v2246_v59 = vmul.f32 %v2182_v42, %v1892_v44  ;;  %v2165_v42 = vld [vmem:[%s6156_s2 + $0x78] sm:$0xff] }
 0x3cc   : > { %v2305_v63 = vmul.f32 %v2241_v37, %v2001_v54  ;;  %v1896_v0 = vpop.f32.mrb[46].mxu1  ;;  %v2247_v8 = vmul.f32 %v2183_v47, %v1894_v53  ;;  %v2161_v37 = vld [vmem:[%s6156_s2 + $0x58] sm:$0xff]  ;;  %v2166_v53 = vld [vmem:[%s6156_s2 + $0x80] sm:$0xff] }
 0x3cd   : > { %v2336_v5 = vpack.c.bf16 %v2304_v52, %v2296_v51  ;;  %v2254_v6 = vmul.f32 %v2190_v43, %v1896_v0  ;;  %v1898_v7 = vpop.f32.mrb[47].mxu1  ;;  %v2170_v54 = vld [vmem:[%s6156_s2 + $0xa0] sm:$0xff]  ;;  %v2205_v4 = vunpack.c.h.bf16 %v2161_v37 }
 0x3ce   : > { %v2337_v9 = vpack.c.bf16 %v2305_v63, %v2297_v60  ;;  %v2255_v10 = vmul.f32 %v2191_v49, %v1898_v7  ;;  %4422 = vmatpush3.bf16.msra.mxu0 %v4864_v50  ;;  %v4875_v49 = vld [vmem:[%s6660_s8 + $0x150] sm:$0xff]   ;;  %v2204_v60 = vunpack.c.l.bf16 %v2161_v37  ;;  %v2212_v63 = vunpack.c.l.bf16 %v2165_v42 }
 0x3cf   : > { %v2310_v58 = vpack.c.bf16 %v2254_v6, %v2246_v59  ;;  %4423 = vmatprep.subr.bf16.mxu0 %v4867_v55  ;;  %v2213_v59 = vunpack.c.h.bf16 %v2165_v42  ;;  %v2214_v7 = vunpack.c.l.bf16 %v2166_v53  ;;  %v2223_v14 = vunpack.c.h.bf16 %v2170_v54  ;;  %v4880_v42 = vld [vmem:[%s6660_s8 + $0x120] sm:$0xff]  }
 0x3d0   : > { %v2311_v56 = vpack.c.bf16 %v2255_v10, %v2247_v8  ;;  %v2111_v18 = vpop.f32.mrb[52].mxu0  ;;  %2975 = vmatprep.mubr.bf16.mxu0 %v2337_v9  ;;  %v2222_v8 = vunpack.c.l.bf16 %v2170_v54  ;;  %v4877_v9 = vld [vmem:[%s6660_s8 + $0x158] sm:$0xff]  }
 0x3d1   : > { %v2113_v36 = vpop.f32.mrb[53].mxu0  ;;  %2976 = vmatmul.mubr.bf16.gmra.mrb[80].mxu0 %v2336_v5  ;;  %v2252_v29 = vmul.f32 %v2188_v15, %v2111_v18  ;;  %v4876_v5 = vld [vmem:[%s6660_s8 + $0x110] sm:$0xff]  }
 0x3d2   : > { %v1902_v25 = vpop.f32.mrb[48].mxu1  ;;  %v2115_v26 = vpop.f32.mrb[54].mxu0  ;;  %2886 = vmatprep.mubr.bf16.mxu1 %v2311_v56  ;;  %4424 = vmatpush3.bf16.msra.mxu0 %v4868_v13  ;;  %v2253_v62 = vmul.f32 %v2189_v19, %v2113_v36  ;;  %v2215_v13 = vunpack.c.h.bf16 %v2166_v53  ;;  %v2173_v36 = vld [vmem:[%s6156_s2 + $0xb8] sm:$0xff] }
 0x3d3   : > { %v2260_v30 = vmul.f32 %v2196_v16, %v2115_v26  ;;  %v1904_v32 = vpop.f32.mrb[49].mxu1  ;;  %v2117_v33 = vpop.f32.mrb[55].mxu0  ;;  %2887 = vmatmul.mubr.bf16.vlgmr.msra.gmra.mrb[76].mxu1 %v2310_v58  ;;  %4425 = vmatprep.subr.bf16.mxu0 %v4871_v17  ;;  %v2262_v43 = vmul.f32 %v2198_v20, %v1902_v25  ;;  %v4879_v26 = vld [vmem:[%s6660_s8 + $0x160] sm:$0xff]  }
 0x3d4   : > { %v2261_v45 = vmul.f32 %v2197_v34, %v2117_v33  ;;  %v1906_v2 = vpop.f32.mrb[50].mxu1  ;;  %4372 = vmatpush3.bf16.msra.mxu1 %v4870_v35  ;;  %v2263_v50 = vmul.f32 %v2199_v38, %v1904_v32  ;;  %v2169_v34 = vld [vmem:[%s6156_s2 + $0x98] sm:$0xff] }
 0x3d5   : > { %v2316_v44 = vpack.c.bf16 %v2260_v30, %v2252_v29  ;;  %v2270_v46 = vmul.f32 %v2206_v22, %v1906_v2  ;;  %v1908_v47 = vpop.f32.mrb[51].mxu1  ;;  %4373 = vmatprep.subr.bf16.mxu1 %v4873_v23  ;;  %v4878_v35 = vld [vmem:[%s6660_s8 + $0x118] sm:$0xff]   ;;  %v2174_v29 = vld [vmem:[%s6156_s2 + $0xc0] sm:$0xff]  ;;  %v2220_v33 = vunpack.c.l.bf16 %v2169_v34  ;;  %v2221_v37 = vunpack.c.h.bf16 %v2169_v34 }
 0x3d6   : > { %v2317_v51 = vpack.c.bf16 %v2261_v45, %v2253_v62  ;;  %v2271_v52 = vmul.f32 %v2207_v39, %v1908_v47  ;;  %4426 = vmatpush3.bf16.msra.mxu0 %v4872_v28  ;;  %v2178_v30 = vld [vmem:[%s6156_s2 + $0xe0] sm:$0xff]  ;;  %v2228_v62 = vunpack.c.l.bf16 %v2173_v36  ;;  %v4881_v47 = vld [vmem:[%s6660_s8 + $0x168] sm:$0xff]  }
 0x3d7   : > { %v2318_v55 = vpack.c.bf16 %v2270_v46, %v2262_v43  ;;  %v2238_v46 = vunpack.c.l.bf16 %v2178_v30 }
 0x3d8   : > { %v2319_v0 = vpack.c.bf16 %v2271_v52, %v2263_v50  ;;  %v2121_v1 = vpop.f32.mrb[56].mxu0  ;;  %4374 = vmatpush3.bf16.msra.mxu1 %v4874_v40  ;;  %3081 = vmatprep.mubr.bf16.mxu0 %v2317_v51  ;;  %v2229_v40 = vunpack.c.h.bf16 %v2173_v36  ;;  %v2231_v51 = vunpack.c.h.bf16 %v2174_v29  ;;  %v2239_v52 = vunpack.c.h.bf16 %v2178_v30  ;;  %v4884_v36 = vld [vmem:[%s6660_s8 + $0x130] sm:$0xff]  }
 0x3d9   : > { %v2123_v6 = vpop.f32.mrb[57].mxu0  ;;  %3082 = vmatmul.mubr.bf16.vlgmr.msra.gmra.mrb[84].mxu0 %v2316_v44  ;;  %4375 = vmatprep.subr.bf16.mxu1 %v4875_v49  ;;  %v2268_v58 = vmul.f32 %v2204_v60, %v2121_v1  ;;  %v2230_v44 = vunpack.c.l.bf16 %v2174_v29 }
 0x3da   : > { %v1912_v10 = vpop.f32.mrb[52].mxu1  ;;  %v2125_v12 = vpop.f32.mrb[58].mxu0  ;;  %2894 = vmatprep.mubr.bf16.mxu1 %v2319_v0  ;;  %v2269_v56 = vmul.f32 %v2205_v4, %v2123_v6  ;;  %v2177_v4 = vld [vmem:[%s6156_s2 + $0xd8] sm:$0xff] }
 0x3db   : > { %v2276_v15 = vmul.f32 %v2212_v63, %v2125_v12  ;;  %v1914_v16 = vpop.f32.mrb[53].mxu1  ;;  %v2127_v17 = vpop.f32.mrb[59].mxu0  ;;  %2895 = vmatmul.mubr.bf16.gmra.mrb[80].mxu1 %v2318_v55  ;;  %v2278_v20 = vmul.f32 %v2214_v7, %v1912_v10  ;;  %v4883_v10 = vld [vmem:[%s6660_s8 + $0x170] sm:$0xff]   ;;  %v2237_v34 = vunpack.c.h.bf16 %v2177_v4 }
 0x3dc   : > { %v2277_v18 = vmul.f32 %v2213_v59, %v2127_v17  ;;  %v1916_v19 = vpop.f32.mrb[54].mxu1  ;;  %4376 = vmatpush3.bf16.msra.mxu1 %v4876_v5  ;;  %v2279_v38 = vmul.f32 %v2215_v13, %v1914_v16  ;;  %v4882_v59 = vld [vmem:[%s6660_s8 + $0x128] sm:$0xff]   ;;  %v2181_v5 = vld [vmem:[%s6156_s2 + $0xf8] sm:$0xff]  ;;  %v2236_v17 = vunpack.c.l.bf16 %v2177_v4 }
 0x3dd   : > { %v2324_v22 = vpack.c.bf16 %v2276_v15, %v2268_v58  ;;  %v2286_v23 = vmul.f32 %v2222_v8, %v1916_v19  ;;  %v1918_v25 = vpop.f32.mrb[55].mxu1  ;;  %4377 = vmatprep.subr.bf16.mxu1 %v4877_v9  ;;  %v2152_v58 = vld [vmem:[%s6156_s2 + $0x10] sm:$0xff] }
 0x3de   : > { %v2325_v39 = vpack.c.bf16 %v2277_v18, %v2269_v56  ;;  %v2287_v28 = vmul.f32 %v2223_v14, %v1918_v25  ;;  %v2156_v15 = vld [vmem:[%s6156_s2 + $0x30] sm:$0xff]  ;;  %v2244_v56 = vunpack.c.l.bf16 %v2181_v5  ;;  %v4885_v25 = vld [vmem:[%s6660_s8 + $0x178] sm:$0xff]  }
 0x3df   : > { %v2326_v32 = vpack.c.bf16 %v2286_v23, %v2278_v20  ;;  %v2194_v23 = vunpack.c.l.bf16 %v2156_v15 }
 0x3e0   : > { %v2327_v45 = vpack.c.bf16 %v2287_v28, %v2279_v38  ;;  %v2131_v2 = vpop.f32.mrb[60].mxu0  ;;  %4378 = vmatpush3.bf16.msra.mxu1 %v4878_v35  ;;  %3089 = vmatprep.mubr.bf16.mxu0 %v2325_v39  ;;  %v2245_v35 = vunpack.c.h.bf16 %v2181_v5  ;;  %v2187_v39 = vunpack.c.h.bf16 %v2152_v58  ;;  %v2195_v28 = vunpack.c.h.bf16 %v2156_v15 }
 0x3e1   : > { %v2133_v43 = vpop.f32.mrb[61].mxu0  ;;  %3090 = vmatmul.mubr.bf16.gmra.mrb[88].mxu0 %v2324_v22  ;;  %4379 = vmatprep.subr.bf16.mxu1 %v4879_v26  ;;  %v2284_v53 = vmul.f32 %v2220_v33, %v2131_v2  ;;  %v2186_v22 = vunpack.c.l.bf16 %v2152_v58 }
 0x3e2   : > { %v1922_v49 = vpop.f32.mrb[56].mxu1  ;;  %v2135_v50 = vpop.f32.mrb[62].mxu0  ;;  %2902 = vmatprep.mubr.bf16.mxu1 %v2327_v45  ;;  %v2285_v63 = vmul.f32 %v2221_v37, %v2133_v43  ;;  %v4886_v37 = vld [vmem:[%s6660_s8 + $0x138] sm:$0xff]  }
 0x3e3   : > { %v2292_v54 = vmul.f32 %v2228_v62, %v2135_v50  ;;  %v1924_v55 = vpop.f32.mrb[57].mxu1  ;;  %v2137_v60 = vpop.f32.mrb[63].mxu0  ;;  %2903 = vmatmul.mubr.bf16.gmra.mrb[84].mxu1 %v2326_v32  ;;  %v2294_v6 = vmul.f32 %v2230_v44, %v1922_v49  ;;  %v2160_v50 = vld [vmem:[%s6156_s2 + $0x50] sm:$0xff] }
 0x3e4   : > { %v2293_v0 = vmul.f32 %v2229_v40, %v2137_v60  ;;  %v1926_v1 = vpop.f32.mrb[58].mxu1  ;;  %4380 = vmatpush3.bf16.msra.mxu1 %v4880_v42  ;;  %v2295_v12 = vmul.f32 %v2231_v51, %v1924_v55  ;;  %v2164_v51 = vld [vmem:[%s6156_s2 + $0x70] sm:$0xff] }
 0x3e5   : > { %v2332_v7 = vpack.c.bf16 %v2292_v54, %v2284_v53  ;;  %v2302_v8 = vmul.f32 %v2238_v46, %v1926_v1  ;;  %v1928_v9 = vpop.f32.mrb[59].mxu1  ;;  %4381 = vmatprep.subr.bf16.mxu1 %v4881_v47  ;;  %v2202_v54 = vunpack.c.l.bf16 %v2160_v50  ;;  %v2210_v55 = vunpack.c.l.bf16 %v2164_v51 }
 0x3e6   : > { %v2333_v13 = vpack.c.bf16 %v2293_v0, %v2285_v63  ;;  %v2303_v14 = vmul.f32 %v2239_v52, %v1928_v9  ;;  %v2203_v63 = vunpack.c.h.bf16 %v2160_v50  ;;  %v2211_v0 = vunpack.c.h.bf16 %v2164_v51  ;;  %v2168_v9 = vld [vmem:[%s6156_s2 + $0x90] sm:$0xff]  ;;  %v3165_v50 = vld [vmem:[%s6662_s16 + $0x18] sm:$0xff] }
 0x3e7   : > { %v2334_v16 = vpack.c.bf16 %v2302_v8, %v2294_v6 }
 0x3e8   : > { %v2335_v18 = vpack.c.bf16 %v2303_v14, %v2295_v12  ;;  %v2141_v19 = vpop.f32.mrb[64].mxu0  ;;  %4382 = vmatpush3.bf16.msra.mxu1 %v4882_v59  ;;  %3097 = vmatprep.mubr.bf16.mxu0 %v2333_v13  ;;  %v2218_v14 = vunpack.c.l.bf16 %v2168_v9 }
 0x3e9   : > { %v2143_v20 = vpop.f32.mrb[65].mxu0  ;;  %3098 = vmatmul.mubr.bf16.gmra.mrb[92].mxu0 %v2332_v7  ;;  %4383 = vmatprep.subr.bf16.mxu1 %v4883_v10  ;;  %v2300_v29 = vmul.f32 %v2236_v17, %v2141_v19  ;;  %v2172_v10 = vld [vmem:[%s6156_s2 + $0xb0] sm:$0xff] }
 0x3ea   : > { %v2038_v26 = vpop.f32.mrb[60].mxu1  ;;  %v2145_v38 = vpop.f32.mrb[66].mxu0  ;;  %2910 = vmatprep.mubr.bf16.mxu1 %v2335_v18  ;;  %v2301_v62 = vmul.f32 %v2237_v34, %v2143_v20  ;;  %v2226_v58 = vunpack.c.l.bf16 %v2172_v10  ;;  %v2227_v17 = vunpack.c.h.bf16 %v2172_v10  ;;  %v3175_v10 = vld [vmem:[%s6662_s16 + $0x68] sm:$0xff] }
 0x3eb   : > { %v2308_v30 = vmul.f32 %v2244_v56, %v2145_v38  ;;  %v2040_v32 = vpop.f32.mrb[61].mxu1  ;;  %v2147_v33 = vpop.f32.mrb[67].mxu0  ;;  %2911 = vmatmul.mubr.bf16.gmra.mrb[88].mxu1 %v2334_v16  ;;  %v2250_v40 = vmul.f32 %v2186_v22, %v2038_v26  ;;  %v2219_v16 = vunpack.c.h.bf16 %v2168_v9  ;;  %v2176_v22 = vld [vmem:[%s6156_s2 + $0xd0] sm:$0xff]  ;;  %v3174_v9 = vld [vmem:[%s6662_s16 + $0x60] sm:$0xff] }
 0x3ec   : > { %v2309_v45 = vmul.f32 %v2245_v35, %v2147_v33  ;;  %v2042_v2 = vpop.f32.mrb[62].mxu1  ;;  %4384 = vmatpush3.bf16.msra.mxu1 %v4884_v36  ;;  %v2251_v46 = vmul.f32 %v2187_v39, %v2040_v32  ;;  %v2234_v38 = vunpack.c.l.bf16 %v2176_v22 }
 0x3ed   : > { %v2340_v42 = vpack.c.bf16 %v2308_v30, %v2300_v29  ;;  %v2258_v43 = vmul.f32 %v2194_v23, %v2042_v2  ;;  %v2044_v44 = vpop.f32.mrb[63].mxu1  ;;  %4385 = vmatprep.subr.bf16.mxu1 %v4885_v25  ;;  %v2180_v23 = vld [vmem:[%s6156_s2 + $0xf0] sm:$0xff]  ;;  %v2235_v29 = vunpack.c.h.bf16 %v2176_v22  ;;  %s5171_s2 = sshll.u32 %s5265_s25, 4  ;;  %s5172_s2 = int_to_ptr.vmem [resolvable:$false] %s5171_s2 }
 0x3ee   : > { %v2341_v47 = vpack.c.bf16 %v2309_v45, %v2301_v62  ;;  %v2259_v49 = vmul.f32 %v2195_v28, %v2044_v44  ;;  %v2242_v39 = vunpack.c.l.bf16 %v2180_v23  ;;  %v2243_v30 = vunpack.c.h.bf16 %v2180_v23  ;;  %v3162_v44 = vld [vmem:[%s6662_s16] sm:$0xff]  ;;  %s5173_s1 = scalar_lea.vmem %s5172_s2, 2048  ;;  %p5174_p4 = scmp.lt.s32.totalorder %s6510_s19, %s5172_s2 }
 0x3ef   : > { %v2314_v52 = vpack.c.bf16 %v2258_v43, %v2250_v40  ;;  %p5175_p8 = scmp.lt.s32.totalorder %s5173_s1, %s5167_s17 }
 0x3f0   : > { %v2315_v53 = vpack.c.bf16 %v2259_v49, %v2251_v46  ;;  %4386 = vmatpush3.bf16.msra.mxu1 %v4886_v37  ;;  %3105 = vmatprep.mubr.bf16.mxu0 %v2341_v47  ;;  %v3163_v46 = vld [vmem:[%s6662_s16 + $0x8] sm:$0xff]  ;;  %v3164_v49 = vld [vmem:[%s6662_s16 + $0x10] sm:$0xff] }
 0x3f1   : > { %3106 = vmatmul.mubr.bf16.gmra.mrb[96].mxu0 %v2340_v42  ;;  %v4623_v47 = vpack.c.bf16 %v3163_v46, %v3162_v44  ;;  %v4629_v51 = vpack.c.bf16 %v3165_v50, %v3164_v49  ;;  %p5176_p13 = por %p5175_p8, %p5174_p4 }
 0x3f2   : > { %v2048_v60 = vpop.f32.mrb[64].mxu1  ;;  %3016 = vmatprep.mubr.bf16.mxu1 %v2315_v53  ;;  %3434 = vmatprep.mubr.bf16.mxu0 %v5262_v24  ;;  %v3167_v53 = vld [vmem:[%s6662_s16 + $0x28] sm:$0xff] }
 0x3f3   : > { %v2050_v1 = vpop.f32.mrb[65].mxu1  ;;  %3017 = vmatmul.mubr.bf16.vlgmr.msra.gmra.mrb[92].mxu1 %v2314_v52  ;;  %v2266_v59 = vmul.f32 %v2202_v54, %v2048_v60  ;;  %4625 = vmatprep.subr.msk.bf16.mxu1 %vm5922_vm3, %v4623_v47  ;;  %v3166_v52 = vld [vmem:[%s6662_s16 + $0x20] sm:$0xff]  ;;  %v3169_v60 = vld [vmem:[%s6662_s16 + $0x38] sm:$0xff]  ;;  %p5177_p12 = pnand %p5176_p13, %p5170_p9 }
 0x3f4   : > { %v2052_v4 = vpop.f32.mrb[66].mxu1  ;;  %v2267_v7 = vmul.f32 %v2203_v63, %v2050_v1  ;;  %v4635_v54 = vpack.c.bf16 %v3167_v53, %v3166_v52  ;;  %v3171_v1 = vld [vmem:[%s6662_s16 + $0x48] sm:$0xff] }
 0x3f5   : > { %v2274_v5 = vmul.f32 %v2210_v55, %v2052_v4  ;;  %v2054_v6 = vpop.f32.mrb[67].mxu1  ;;  %v3168_v55 = vld [vmem:[%s6662_s16 + $0x30] sm:$0xff] }
 0x3f6   : > { %v2275_v8 = vmul.f32 %v2211_v0, %v2054_v6  ;;  %v4641_v63 = vpack.c.bf16 %v3169_v60, %v3168_v55  ;;  %v3170_v0 = vld [vmem:[%s6662_s16 + $0x40] sm:$0xff]  ;;  %v3172_v6 = vld [vmem:[%s6662_s16 + $0x50] sm:$0xff] }
 0x3f7   : > { %v2322_v12 = vpack.c.bf16 %v2274_v5, %v2266_v59  ;;  %v4647_v4 = vpack.c.bf16 %v3171_v1, %v3170_v0  ;;  %v4887_v59 = vld [vmem:[#allocation11] ss:$8 sps:$4 sm:$0xff]   ;;  %v4889_v5 = vld [vmem:[#allocation11 + $0x4] ss:$8 sps:$4 sm:$0xff]  }
 0x3f8   : > { %v2323_v13 = vpack.c.bf16 %v2275_v8, %v2267_v7  ;;  %v3173_v7 = vld [vmem:[%s6662_s16 + $0x58] sm:$0xff]  ;;  %3402 = vmatprep.subr.bf16.mxu0 %v4889_v5 }
 0x3f9   : > { %4628 = vmatpush3.bf16.xpose.msk.msra.mxu1 %vm5922_vm3, %v4623_v47  ;;  %v4653_v8 = vpack.c.bf16 %v3173_v7, %v3172_v6  ;;  %3403 = vmatpush1.bf16.msra.mxu0 %v4887_v59 }
 0x3fa   : > { %v2058_v15 = vpop.f32.mrb[68].mxu1  ;;  %3024 = vmatprep.mubr.bf16.mxu1 %v2323_v13  ;;  %4631 = vmatprep.subr.msk.bf16.mxu1 %vm5922_vm3, %v4629_v51  ;;  %v3176_v13 = vld [vmem:[%s6662_s16 + $0x70] sm:$0xff] }
 0x3fb   : > { %v2060_v56 = vpop.f32.mrb[69].mxu1  ;;  %3025 = vmatmul.mubr.bf16.gmra.mrb[96].mxu1 %v2322_v12  ;;  %v2282_v19 = vmul.f32 %v2218_v14, %v2058_v15  ;;  %v4659_v12 = vpack.c.bf16 %v3175_v10, %v3174_v9  ;;  %v3177_v14 = vld [vmem:[%s6662_s16 + $0x78] sm:$0xff] }
 0x3fc   : > { %v2062_v18 = vpop.f32.mrb[70].mxu1  ;;  %v2283_v36 = vmul.f32 %v2219_v16, %v2060_v56  ;;  %v4892_v15 = vld [vmem:[#allocation11 + $0x14] ss:$8 sps:$4 sm:$0xff]   ;;  %v4890_v16 = vld [vmem:[#allocation11 + $0x10] ss:$8 sps:$4 sm:$0xff]  }
 0x3fd   : > { %v2290_v34 = vmul.f32 %v2226_v58, %v2062_v18  ;;  %v2064_v35 = vpop.f32.mrb[71].mxu1  ;;  %v4665_v58 = vpack.c.bf16 %v3177_v14, %v3176_v13  ;;  %3404 = vmatprep.subr.bf16.mxu0 %v4892_v15 }
 0x3fe   : > { %v2291_v20 = vmul.f32 %v2227_v17, %v2064_v35  ;;  %3405 = vmatpush1.bf16.msra.mxu0 %v4890_v16  ;;  %v4893_v17 = vld [vmem:[#allocation13 + $0x40] sm:$0xff]  }
 0x3ff   : > { %v2330_v25 = vpack.c.bf16 %v2290_v34, %v2282_v19  ;;  %4475 = vmatprep.subr.bf16.mxu0 %v4893_v17 }
 0x400   : > { %v2331_v26 = vpack.c.bf16 %v2291_v20, %v2283_v36 }
 0x401   : > { %4634 = vmatpush3.bf16.xpose.msk.msra.mxu1 %vm5922_vm3, %v4629_v51 }
 0x402   : > { %v2068_v28 = vpop.f32.mrb[72].mxu1  ;;  %3032 = vmatprep.mubr.bf16.mxu1 %v2331_v26  ;;  %4637 = vmatprep.subr.msk.bf16.mxu1 %vm5922_vm3, %v4635_v54 }
 0x403   : > { %v2070_v32 = vpop.f32.mrb[73].mxu1  ;;  %3033 = vmatmul.mubr.bf16.gmra.mrb[100].mxu1 %v2330_v25  ;;  %v2298_v62 = vmul.f32 %v2234_v38, %v2068_v28 }
 0x404   : > { %v2072_v33 = vpop.f32.mrb[74].mxu1  ;;  %v2299_v37 = vmul.f32 %v2235_v29, %v2070_v32 }
 0x405   : > { %v2306_v45 = vmul.f32 %v2242_v39, %v2072_v33  ;;  %v2074_v2 = vpop.f32.mrb[75].mxu1 }
 0x406   : > { %v2307_v40 = vmul.f32 %v2243_v30, %v2074_v2 }
 0x407   : > { %v2338_v42 = vpack.c.bf16 %v2306_v45, %v2298_v62 }
 0x408   : > { %v2339_v43 = vpack.c.bf16 %v2307_v40, %v2299_v37 }
 0x409   : > { %4640 = vmatpush3.bf16.xpose.msk.msra.mxu1 %vm5922_vm3, %v4635_v54 }
 0x40a   : > { %3040 = vmatprep.mubr.bf16.mxu1 %v2339_v43  ;;  %4643 = vmatprep.subr.msk.bf16.mxu1 %vm5922_vm3, %v4641_v63 }
 0x40b   : > { %3041 = vmatmul.mubr.bf16.gmra.mrb[104].mxu1 %v2338_v42 }
 0x411   : > { %4646 = vmatpush3.bf16.xpose.msk.msra.mxu1 %vm5922_vm3, %v4641_v63 }
 0x412   : > { %4649 = vmatprep.subr.msk.bf16.mxu1 %vm5922_vm3, %v4647_v4 }
 0x419   : > { %4652 = vmatpush3.bf16.xpose.msk.msra.mxu1 %vm5922_vm3, %v4647_v4 }
 0x41a   : > { %4655 = vmatprep.subr.msk.bf16.mxu1 %vm5922_vm3, %v4653_v8 }
 0x421   : > { %4658 = vmatpush3.bf16.xpose.msk.msra.mxu1 %vm5922_vm3, %v4653_v8 }
 0x422   : > { %4661 = vmatprep.subr.msk.bf16.mxu1 %vm5922_vm3, %v4659_v12 }
 0x429   : > { %4664 = vmatpush3.bf16.xpose.msk.msra.mxu1 %vm5922_vm3, %v4659_v12 }
 0x42a   : > { %4667 = vmatprep.subr.msk.bf16.mxu1 %vm5922_vm3, %v4665_v58 }
 0x431   : > { %4670 = vmatpush3.bf16.xpose.msk.msra.mxu1 %vm5922_vm3, %v4665_v58 }
 0x48c   : > { %v4347_v56 = vpop.f32.mrb[68].mxu0 }
 0x48d   : > { %v4348_v18 = vpop.f32.mrb[69].mxu0 }
 0x48e   : > { %v4349_v19 = vadd.f32 %v4348_v18, %v4347_v56  ;;  %v4350_v34 = vpop.f32.mrb[70].mxu0 }
 0x48f   : > { %v4351_v35 = vpop.f32.mrb[71].mxu0 }
 0x490   : > { %v4352_v36 = vadd.f32 %v4351_v35, %v4350_v34 }
 0x494   : > { %v4353_v20 = vpop.f32.mrb[72].mxu0 }
 0x495   : > { %v4354_v22 = vpop.f32.mrb[73].mxu0 }
 0x496   : > { %v4355_v23 = vadd.f32 %v4354_v22, %v4353_v20  ;;  %v4356_v25 = vpop.f32.mrb[74].mxu0 }
 0x497   : > { %v4357_v26 = vpop.f32.mrb[75].mxu0 }
 0x498   : > { %v4358_v38 = vadd.f32 %v4357_v26, %v4356_v25 }
 0x49c   : > { %v4359_v21 = vpop.f32.mrb[76].mxu0 }
 0x49d   : > { %v4360_v39 = vpop.f32.mrb[77].mxu0 }
 0x49e   : > { %v4361_v28 = vadd.f32 %v4360_v39, %v4359_v21  ;;  %v4362_v29 = vpop.f32.mrb[78].mxu0 }
 0x49f   : > { %v4363_v30 = vpop.f32.mrb[79].mxu0 }
 0x4a0   : > { %v4364_v32 = vadd.f32 %v4363_v30, %v4362_v29 }
 0x4a4   : > { %v4365_v33 = vpop.f32.mrb[80].mxu0 }
 0x4a5   : > { %v4366_v62 = vpop.f32.mrb[81].mxu0 }
 0x4a6   : > { %v4367_v45 = vadd.f32 %v4366_v62, %v4365_v33  ;;  %v4307_v2 = vpop.f32.mrb[76].mxu1  ;;  %v4368_v37 = vpop.f32.mrb[82].mxu0 }
 0x4a7   : > { %v4308_v40 = vpop.f32.mrb[77].mxu1  ;;  %v4369_v42 = vpop.f32.mrb[83].mxu0 }
 0x4a8   : > { %v4309_v43 = vadd.f32 %v4308_v40, %v4307_v2  ;;  %v4370_v44 = vadd.f32 %v4369_v42, %v4368_v37  ;;  %v4310_v46 = vpop.f32.mrb[78].mxu1 }
 0x4a9   : > { %v4311_v47 = vpop.f32.mrb[79].mxu1 }
 0x4aa   : > { %v2954_v49 = vadd.f32 %v4349_v19, %v4309_v43  ;;  %v4312_v50 = vadd.f32 %v4311_v47, %v4310_v46 }
 0x4ac   : > { %v2957_v51 = vadd.f32 %v4352_v36, %v4312_v50  ;;  %v4427_v52 = vpop.f32.mrb[84].mxu0 }
 0x4ad   : > { %v4428_v53 = vpop.f32.mrb[85].mxu0 }
 0x4ae   : > { %v4429_v54 = vadd.f32 %v4428_v53, %v4427_v52  ;;  %v4313_v55 = vpop.f32.mrb[80].mxu1  ;;  %v4430_v60 = vpop.f32.mrb[86].mxu0 }
 0x4af   : > { %v4314_v63 = vpop.f32.mrb[81].mxu1  ;;  %v4431_v0 = vpop.f32.mrb[87].mxu0 }
 0x4b0   : > { %v4315_v1 = vadd.f32 %v4314_v63, %v4313_v55  ;;  %v4432_v4 = vadd.f32 %v4431_v0, %v4430_v60  ;;  %v4316_v59 = vpop.f32.mrb[82].mxu1 }
 0x4b1   : > { %v4317_v5 = vpop.f32.mrb[83].mxu1 }
 0x4b2   : > { %v2962_v6 = vadd.f32 %v4355_v23, %v4315_v1  ;;  %v4318_v7 = vadd.f32 %v4317_v5, %v4316_v59  ;;  %v3123_v1 = vpop.permute.xlu0 %3122 }
 0x4b4   : > { %v6377_v8 = vadd.f32 %v4358_v38, %v4318_v7  ;;  %v4433_v9 = vpop.f32.mrb[88].mxu0 }
 0x4b5   : > { %v4434_v10 = vpop.f32.mrb[89].mxu0 }
 0x4b6   : > { %v4435_v12 = vadd.f32 %v4434_v10, %v4433_v9  ;;  %v4319_v13 = vpop.f32.mrb[84].mxu1  ;;  %v4436_v14 = vpop.f32.mrb[90].mxu0 }
 0x4b7   : > { %v4320_v58 = vpop.f32.mrb[85].mxu1  ;;  %v4437_v15 = vpop.f32.mrb[91].mxu0 }
 0x4b8   : > { %v4321_v16 = vadd.f32 %v4320_v58, %v4319_v13  ;;  %v4438_v17 = vadd.f32 %v4437_v15, %v4436_v14  ;;  %v4322_v56 = vpop.f32.mrb[86].mxu1  ;;  %v3125_v13 = vpop.permute.xlu1 %3124 }
 0x4b9   : > { %v4323_v18 = vpop.f32.mrb[87].mxu1 }
 0x4ba   : > { %v6379_v19 = vadd.f32 %v4361_v28, %v4321_v16  ;;  %v4324_v34 = vadd.f32 %v4323_v18, %v4322_v56 }
 0x4bc   : > { %v6381_v35 = vadd.f32 %v4364_v32, %v4324_v34  ;;  %v4439_v36 = vpop.f32.mrb[92].mxu0  ;;  %v3127_v34 = vpop.permute.xlu0 %3126 }
 0x4bd   : > { %v4440_v20 = vpop.f32.mrb[93].mxu0 }
 0x4be   : > { %v6383_v22 = vadd.f32 %v4440_v20, %v4439_v36  ;;  %v4325_v23 = vpop.f32.mrb[88].mxu1  ;;  %v4442_v25 = vpop.f32.mrb[94].mxu0 }
 0x4bf   : > { %v4326_v26 = vpop.f32.mrb[89].mxu1  ;;  %v4443_v38 = vpop.f32.mrb[95].mxu0 }
 0x4c0   : > { %v4327_v21 = vadd.f32 %v4326_v26, %v4325_v23  ;;  %v6385_v39 = vadd.f32 %v4443_v38, %v4442_v25  ;;  %v4328_v29 = vpop.f32.mrb[90].mxu1  ;;  %v3129_v26 = vpop.permute.xlu1 %3128 }
 0x4c1   : > { %v4329_v30 = vpop.f32.mrb[91].mxu1 }
 0x4c2   : > { %v6387_v33 = vadd.f32 %v4367_v45, %v4327_v21  ;;  %v4330_v28 = vadd.f32 %v4329_v30, %v4328_v29  ;;  %v6398_v45 = vld [vmem:[%s6663_s18] ss:$0 sm:$0xff] }
 0x4c3   : > { %v1708_v60 = vadd.f32 %v6398_v45, %v6162_v41  ;;  %v1713_v59 = vadd.f32 %v6160_v3, %v6398_v45 }
 0x4c4   : > { %v6389_v62 = vadd.f32 %v4370_v44, %v4330_v28  ;;  %v4445_v32 = vpop.f32.mrb[96].mxu0 }
 0x4c5   : > { %v4446_v2 = vpop.f32.mrb[97].mxu0 }
 0x4c6   : > { %v6391_v37 = vadd.f32 %v4446_v2, %v4445_v32  ;;  %v4387_v40 = vpop.f32.mrb[92].mxu1  ;;  %v4448_v42 = vpop.f32.mrb[98].mxu0  ;;  %v1728_v32 = vadd.f32 %v6398_v45, %v6189_v57 }
 0x4c7   : > { %v4388_v43 = vpop.f32.mrb[93].mxu1  ;;  %v4449_v46 = vpop.f32.mrb[99].mxu0 }
 0x4c8   : > { %v4389_v47 = vadd.f32 %v4388_v43, %v4387_v40  ;;  %v6393_v50 = vadd.f32 %v4449_v46, %v4448_v42  ;;  %v4390_v52 = vpop.f32.mrb[94].mxu1  ;;  %v3131_v2 = vpop.permute.xlu0 %3130  ;;  %v1733_v42 = vadd.f32 %v6184_v11, %v6398_v45 }
 0x4c9   : > { %v4391_v53 = vpop.f32.mrb[95].mxu1  ;;  %v3133_v57 = vpop.permute.xlu1 %3132 }
 0x4ca   : > { %v3019_v44 = vadd.f32 %v4389_v47, %v2954_v49  ;;  %v4392_v55 = vadd.f32 %v4391_v53, %v4390_v52  ;;  %v4894_v47 = vld [vmem:[#allocation13] sm:$0xff]  }
 0x4cc   : > { %v3022_v63 = vadd.f32 %v4392_v55, %v2957_v51  ;;  %v3084_v0 = vadd.f32 %v4429_v54, %v3019_v44  ;;  %v1718_v51 = vadd.f32 %v6398_v45, %v6171_v48 }
 0x4ce   : > { %v4393_v5 = vpop.f32.mrb[96].mxu1  ;;  %v3114_v7 = vadd.f32 %v3084_v0, %v1708_v60  ;;  %v3087_v9 = vadd.f32 %v4432_v4, %v3022_v63  ;;  %v1723_v4 = vadd.f32 %v6166_v61, %v6398_v45 }
 0x4cf   : > { %v4394_v10 = vpop.f32.mrb[97].mxu1 }
 0x4d0   : > { %v3146_v14 = vadd.f32 %v3123_v1, %v3114_v7  ;;  %v4395_v58 = vadd.f32 %v4394_v10, %v4393_v5  ;;  %v4396_v15 = vpop.f32.mrb[98].mxu1  ;;  %v3115_v16 = vadd.f32 %v3087_v9, %v1713_v59  ;;  %v4897_v59 = vld [vmem:[#allocation13 + $0x50] sm:$0xff]   ;;  %v1738_v7 = vadd.f32 %v6398_v45, %v6209_v31  ;;  %v3137_v31 = vpop.permute.xlu1 %3136 }
 0x4d1   : > { %v4397_v49 = vpop.f32.mrb[99].mxu1 }
 0x4d2   : > { %4925 = vtanh.f32 %v3146_v14  ;;  %v3027_v56 = vadd.f32 %v4395_v58, %v2962_v6  ;;  %v3147_v18 = vadd.f32 %v3125_v13, %v3115_v16  ;;  %v4398_v41 = vadd.f32 %v4397_v49, %v4396_v15  ;;  %v4898_v16 = vld [vmem:[#allocation13 + $0x10] sm:$0xff]  }
 0x4d3   : > { %v1743_v14 = vadd.f32 %v6202_v27, %v6398_v45  ;;  %v4900_v27 = vld [vmem:[#allocation13 + $0x18] sm:$0xff]  }
 0x4d4   : > { %4927 = vtanh.f32 %v3147_v18  ;;  %v3030_v3 = vadd.f32 %v4398_v41, %v6377_v8  ;;  %v3092_v54 = vadd.f32 %v4435_v12, %v3027_v56 }
 0x4d6   : > { %v4399_v36 = vpop.f32.mrb[100].mxu1  ;;  %v3116_v20 = vadd.f32 %v3092_v54, %v1718_v51  ;;  %v3095_v23 = vadd.f32 %v4438_v17, %v3030_v3  ;;  %v4902_v51 = vld [vmem:[#allocation13 + $0x20] sm:$0xff]   ;;  %v4903_v54 = vld [vmem:[#allocation13 + $0x68] sm:$0xff]  }
 0x4d7   : > { %v4400_v25 = vpop.f32.mrb[101].mxu1 }
 0x4d8   : > { %v3148_v38 = vadd.f32 %v3127_v34, %v3116_v20  ;;  %v4401_v6 = vadd.f32 %v4400_v25, %v4399_v36  ;;  %v4402_v21 = vpop.f32.mrb[102].mxu1  ;;  %v3117_v29 = vadd.f32 %v3095_v23, %v1723_v4  ;;  %v4904_v20 = vld [vmem:[#allocation13 + $0x28] sm:$0xff]   ;;  %v4905_v23 = vld [vmem:[#allocation13 + $0x70] sm:$0xff]  }
 0x4d9   : > { %v4403_v30 = vpop.f32.mrb[103].mxu1  ;;  %v4906_v25 = vld [vmem:[#allocation13 + $0x30] sm:$0xff]  }
 0x4da   : > { %4929 = vtanh.f32 %v3148_v38  ;;  %v3035_v48 = vadd.f32 %v4401_v6, %v6379_v19  ;;  %v3149_v28 = vadd.f32 %v3129_v26, %v3117_v29  ;;  %v4404_v8 = vadd.f32 %v4403_v30, %v4402_v21  ;;  %v4908_v26 = vld [vmem:[#allocation13 + $0x38] sm:$0xff]   ;;  %v3475_v38 = vld [vmem:[%s5669_s7] sm:$0xff]  ;;  %v3476_v6 = vld [vmem:[%s5669_s7 + $0x8] sm:$0xff] }
 0x4db   : > { %v3483_v30 = vunpack.c.l.bf16 %v3475_v38 }
 0x4dc   : > { %v4926_v12 = vpop.eup %4925  ;;  %4931 = vtanh.f32 %v3149_v28  ;;  %v3038_v61 = vadd.f32 %v4404_v8, %v6381_v35  ;;  %v3100_v17 = vadd.f32 %v6383_v22, %v3035_v48  ;;  %v4895_v35 = vld [vmem:[#allocation13 + $0x48] sm:$0xff]   ;;  %v3485_v48 = vunpack.c.l.bf16 %v3476_v6 }
 0x4dd   : > { %4587 = vmatprep.mubr.msk.f32.mxu1 %vm1604_vm2, %v4926_v12  ;;  %v3484_v8 = vunpack.c.h.bf16 %v3475_v38 }
 0x4de   : > { %v4928_v40 = vpop.eup %4927  ;;  %v4405_v43 = vpop.f32.mrb[104].mxu1  ;;  %v3118_v19 = vadd.f32 %v3100_v17, %v1728_v32  ;;  %v3103_v46 = vadd.f32 %v6385_v39, %v3038_v61  ;;  %v4896_v39 = vld [vmem:[#allocation13 + $0x8] sm:$0xff]  }
 0x4df   : > { %v3362_v52 = vpack.c.bf16 %v4928_v40, %v4926_v12  ;;  %v4406_v53 = vpop.f32.mrb[105].mxu1  ;;  %4588 = vmatmul.mubr.msk.f32.vlgmr.msra.gmra.mrb[108].mxu1 %vm1604_vm2, %v4928_v40  ;;  %v3486_v12 = vunpack.c.h.bf16 %v3476_v6 }
 0x4e0   : > { %v3150_v44 = vadd.f32 %v3131_v2, %v3118_v19  ;;  %v4407_v22 = vadd.f32 %v4406_v53, %v4405_v43  ;;  %v4408_v55 = vpop.f32.mrb[106].mxu1  ;;  %v3119_v60 = vadd.f32 %v3103_v46, %v1733_v42  ;;  %v3477_v19 = vld [vmem:[%s5669_s7 + $0x10] sm:$0xff]  ;;  %v3478_v46 = vld [vmem:[%s5669_s7 + $0x18] sm:$0xff] }
 0x4e1   : > { %v4409_v63 = vpop.f32.mrb[107].mxu1  ;;  %4154 = vmatmul.mubr.msk.bf16.vlgmr.msra.gmra.mrb[100].mxu0 %vm1604_vm2, %v3362_v52 }
 0x4e2   : > { %4933 = vtanh.f32 %v3150_v44  ;;  %v3043_v11 = vadd.f32 %v4407_v22, %v6387_v33  ;;  %v3151_v0 = vadd.f32 %v3133_v57, %v3119_v60  ;;  %v4410_v1 = vadd.f32 %v4409_v63, %v4408_v55  ;;  %3444 = vmatprep.mubr.bf16.mxu0 %v5262_v24  ;;  %4476 = vmatpush3.bf16.msra.mxu0 %v4894_v47  ;;  %v3135_v33 = vpop.permute.xlu0 %3134 }
 0x4e3   : > { %4477 = vmatprep.subr.bf16.mxu0 %v4895_v35  ;;  %v3487_v35 = vunpack.c.l.bf16 %v3477_v19  ;;  %v3489_v44 = vunpack.c.l.bf16 %v3478_v46  ;;  %v3488_v55 = vunpack.c.h.bf16 %v3477_v19  ;;  %v3490_v60 = vunpack.c.h.bf16 %v3478_v46  ;;  %v709_v19 = vld [vmem:[%s5653_s26 + $0x8] sm:$0xff] }
 0x4e4   : > { %v4930_v5 = vpop.eup %4929  ;;  %4935 = vtanh.f32 %v3151_v0  ;;  %v3046_v9 = vadd.f32 %v4410_v1, %v6389_v62  ;;  %v3108_v10 = vadd.f32 %v6391_v37, %v3043_v11  ;;  %v4899_v62 = vld [vmem:[#allocation13 + $0x58] sm:$0xff]  }
 0x4e5   : > { %4590 = vmatprep.mubr.msk.f32.mxu1 %vm1604_vm2, %v4930_v5 }
 0x4e6   : > { %v4932_v13 = vpop.eup %4931  ;;  %v3120_v58 = vadd.f32 %v3108_v10, %v1738_v7  ;;  %v3111_v15 = vadd.f32 %v6393_v50, %v3046_v9  ;;  %4478 = vmatpush3.bf16.msra.mxu0 %v4896_v39  ;;  %v4901_v50 = vld [vmem:[#allocation13 + $0x60] sm:$0xff]   ;;  %v3480_v9 = vld [vmem:[%s5669_s7 + $0x28] sm:$0xff] }
 0x4e7   : > { %4591 = vmatmul.mubr.msk.f32.gmra.mrb[110].mxu1 %vm1604_vm2, %v4932_v13  ;;  %v3363_v49 = vpack.c.bf16 %v4932_v13, %v4930_v5  ;;  %4479 = vmatprep.subr.bf16.mxu0 %v4897_v59  ;;  %v3479_v7 = vld [vmem:[%s5669_s7 + $0x20] sm:$0xff] }
 0x4e8   : > { %v3152_v56 = vadd.f32 %v3135_v33, %v3120_v58  ;;  %v3121_v37 = vadd.f32 %v3111_v15, %v1743_v14  ;;  %v3491_v58 = vunpack.c.l.bf16 %v3479_v7  ;;  %v3493_v15 = vunpack.c.l.bf16 %v3480_v9 }
 0x4e9   : > { %4155 = vmatmul.mubr.msk.bf16.gmra.mrb[104].mxu0 %vm1604_vm2, %v3363_v49  ;;  %v3494_v49 = vunpack.c.h.bf16 %v3480_v9  ;;  %v715_v9 = vld [vmem:[%s5653_s26 + $0x38] sm:$0xff] }
 0x4ea   : > { %4937 = vtanh.f32 %v3152_v56  ;;  %v3153_v18 = vadd.f32 %v3137_v31, %v3121_v37  ;;  %3454 = vmatprep.mubr.bf16.mxu0 %v5262_v24  ;;  %4480 = vmatpush3.bf16.msra.mxu0 %v4898_v16  ;;  %v3492_v31 = vunpack.c.h.bf16 %v3479_v7 }
 0x4eb   : > { %4481 = vmatprep.subr.bf16.mxu0 %v4899_v62 }
 0x4ec   : > { %v4934_v45 = vpop.eup %4933  ;;  %4939 = vtanh.f32 %v3153_v18 }
 0x4ed   : > { %4593 = vmatprep.mubr.msk.f32.mxu1 %vm1604_vm2, %v4934_v45 }
 0x4ee   : > { %v4936_v41 = vpop.eup %4935  ;;  %4482 = vmatpush3.bf16.msra.mxu0 %v4900_v27 }
 0x4ef   : > { %4594 = vmatmul.mubr.msk.f32.gmra.mrb[112].mxu1 %vm1604_vm2, %v4936_v41  ;;  %v3364_v3 = vpack.c.bf16 %v4936_v41, %v4934_v45  ;;  %4483 = vmatprep.subr.bf16.mxu0 %v4901_v50  ;;  %v3481_v41 = vld [vmem:[%s5669_s7 + $0x30] sm:$0xff] }
 0x4f1   : > { %4156 = vmatmul.mubr.msk.bf16.gmra.mrb[108].mxu0 %vm1604_vm2, %v3364_v3 }
 0x4f2   : > { %3464 = vmatprep.mubr.bf16.mxu0 %v5262_v24  ;;  %4484 = vmatpush3.bf16.msra.mxu0 %v4902_v51  ;;  %v4907_v24 = vld [vmem:[#allocation13 + $0x78] sm:$0xff]  }
 0x4f3   : > { %4485 = vmatprep.subr.bf16.mxu0 %v4903_v54  ;;  %v3482_v51 = vld [vmem:[%s5669_s7 + $0x38] sm:$0xff] }
 0x4f4   : > { %v4938_v34 = vpop.eup %4937 }
 0x4f5   : > { %4596 = vmatprep.mubr.msk.f32.mxu1 %vm1604_vm2, %v4938_v34 }
 0x4f6   : > { %v4940_v4 = vpop.eup %4939  ;;  %4486 = vmatpush3.bf16.msra.mxu0 %v4904_v20  ;;  %v3497_v20 = vunpack.c.l.bf16 %v3482_v51 }
 0x4f7   : > { %4597 = vmatmul.mubr.msk.f32.gmra.mrb[114].mxu1 %vm1604_vm2, %v4940_v4  ;;  %v3365_v36 = vpack.c.bf16 %v4940_v4, %v4938_v34  ;;  %4487 = vmatprep.subr.bf16.mxu0 %v4905_v23 }
 0x4f9   : > { %4157 = vmatmul.mubr.msk.bf16.gmra.mrb[112].mxu0 %vm1604_vm2, %v3365_v36  ;;  %v3495_v36 = vunpack.c.l.bf16 %v3481_v41 }
 0x4fa   : > { %4488 = vmatpush3.bf16.msra.mxu0 %v4906_v25  ;;  %v3496_v25 = vunpack.c.h.bf16 %v3481_v41 }
 0x4fb   : > { %4489 = vmatprep.subr.bf16.mxu0 %v4907_v24  ;;  %v3498_v24 = vunpack.c.h.bf16 %v3482_v51 }
 0x4fe   : > { %4490 = vmatpush3.bf16.msra.mxu0 %v4908_v26 }
 0x5b2   : > { %v6442_v21 = vpop.f32.mrb[108].mxu1 }
 0x5b3   : > { %v6444_v29 = vpop.f32.mrb[109].mxu1 }
 0x5b4   : > { %v3436_v28 = vpop.f32.mrb[100].mxu0 }
 0x5b5   : > { %v3438_v32 = vpop.f32.mrb[101].mxu0  ;;  %v3499_v17 = vmul.f32 %v3483_v30, %v3436_v28 }
 0x5b6   : > { %v3440_v61 = vpop.f32.mrb[102].mxu0  ;;  %v3500_v42 = vmul.f32 %v3484_v8, %v3438_v32 }
 0x5b7   : > { %v3501_v2 = vmul.f32 %v3485_v48, %v3440_v61  ;;  %v3442_v40 = vpop.f32.mrb[103].mxu0  ;;  %v6467_v61 = vld [vmem:[%s6664_s27] ss:$0 sm:$0xff] }
 0x5b8   : > { %v3502_v43 = vmul.f32 %v3486_v12, %v3442_v40  ;;  %v3324_v40 = vadd.f32 %v6467_v61, %v6444_v29 }
 0x5b9   : > { %v3515_v47 = vpack.c.bf16 %v3501_v2, %v3499_v17 }
 0x5ba   : > { %v3516_v52 = vpack.c.bf16 %v3502_v43, %v3500_v42  ;;  %v6448_v53 = vpop.f32.mrb[110].mxu1 }
 0x5bb   : > { %v6450_v57 = vpop.f32.mrb[111].mxu1 }
 0x5bc   : > { %v3446_v22 = vpop.f32.mrb[104].mxu0  ;;  %3683 = vmatprep.mubr.bf16.mxu0 %v3516_v52  ;;  %v3334_v29 = vadd.f32 %v6467_v61, %v6450_v57 }
 0x5bd   : > { %v3448_v63 = vpop.f32.mrb[105].mxu0  ;;  %3684 = vmatmul.mubr.bf16.vlgmr.msra.gmra.mrb[116].mxu0 %v3515_v47  ;;  %v3503_v0 = vmul.f32 %v3487_v35, %v3446_v22  ;;  %v3329_v47 = vadd.f32 %v6442_v21, %v6467_v61  ;;  %v3339_v21 = vadd.f32 %v6448_v53, %v6467_v61  ;;  %v717_v53 = vld [vmem:[%s5653_s26 + $0x48] sm:$0xff] }
 0x5be   : > { %v3450_v11 = vpop.f32.mrb[106].mxu0  ;;  %v3504_v59 = vmul.f32 %v3488_v55, %v3448_v63 }
 0x5bf   : > { %v3505_v1 = vmul.f32 %v3489_v44, %v3450_v11  ;;  %v3452_v39 = vpop.f32.mrb[107].mxu0  ;;  %v711_v44 = vld [vmem:[%s5653_s26 + $0x18] sm:$0xff] }
 0x5c0   : > { %v3506_v5 = vmul.f32 %v3490_v60, %v3452_v39  ;;  %v713_v39 = vld [vmem:[%s5653_s26 + $0x28] sm:$0xff] }
 0x5c1   : > { %v3517_v10 = vpack.c.bf16 %v3505_v1, %v3503_v0 }
 0x5c2   : > { %v3518_v33 = vpack.c.bf16 %v3506_v5, %v3504_v59  ;;  %v6454_v13 = vpop.f32.mrb[112].mxu1 }
 0x5c3   : > { %v6456_v14 = vpop.f32.mrb[113].mxu1 }
 0x5c4   : > { %v3456_v16 = vpop.f32.mrb[108].mxu0  ;;  %3691 = vmatprep.mubr.bf16.mxu0 %v3518_v33 }
 0x5c5   : > { %v3458_v62 = vpop.f32.mrb[109].mxu0  ;;  %3692 = vmatmul.mubr.bf16.gmra.mrb[120].mxu0 %v3517_v10  ;;  %v3507_v37 = vmul.f32 %v3491_v58, %v3456_v16 }
 0x5c6   : > { %v3460_v56 = vpop.f32.mrb[110].mxu0  ;;  %v3508_v50 = vmul.f32 %v3492_v31, %v3458_v62  ;;  %v3344_v31 = vadd.f32 %v6467_v61, %v6456_v14  ;;  %v719_v14 = vld [vmem:[%s5653_s26 + $0x58] sm:$0xff] }
 0x5c7   : > { %v3509_v18 = vmul.f32 %v3493_v15, %v3460_v56  ;;  %v3462_v27 = vpop.f32.mrb[111].mxu0 }
 0x5c8   : > { %v3510_v45 = vmul.f32 %v3494_v49, %v3462_v27 }
 0x5c9   : > { %v3519_v3 = vpack.c.bf16 %v3509_v18, %v3507_v37  ;;  %v3349_v18 = vadd.f32 %v6454_v13, %v6467_v61 }
 0x5ca   : > { %v3520_v54 = vpack.c.bf16 %v3510_v45, %v3508_v50  ;;  %v6460_v34 = vpop.f32.mrb[114].mxu1 }
 0x5cb   : > { %v6462_v4 = vpop.f32.mrb[115].mxu1 }
 0x5cc   : > { %v3466_v23 = vpop.f32.mrb[112].mxu0  ;;  %3699 = vmatprep.mubr.bf16.mxu0 %v3520_v54 }
 0x5cd   : > { %v3468_v26 = vpop.f32.mrb[113].mxu0  ;;  %3700 = vmatmul.mubr.bf16.gmra.mrb[124].mxu0 %v3519_v3  ;;  %v3511_v6 = vmul.f32 %v3495_v36, %v3466_v23 }
 0x5ce   : > { %v3470_v38 = vpop.f32.mrb[114].mxu0  ;;  %v3512_v28 = vmul.f32 %v3496_v25, %v3468_v26  ;;  %v721_v25 = vld [vmem:[%s5653_s26 + $0x68] sm:$0xff] }
 0x5cf   : > { %v3513_v30 = vmul.f32 %v3497_v20, %v3470_v38  ;;  %v3472_v48 = vpop.f32.mrb[115].mxu0  ;;  %v3354_v20 = vadd.f32 %v6467_v61, %v6462_v4  ;;  %v3359_v38 = vadd.f32 %v6460_v34, %v6467_v61 }
 0x5d0   : > { %v3514_v8 = vmul.f32 %v3498_v24, %v3472_v48  ;;  %v723_v48 = vld [vmem:[%s5653_s26 + $0x78] sm:$0xff]  ;;  %s3749_s26 = scalar_lea.sflag [#allocation4], %s5649_s12 }
 0x5d1   : > { %v3521_v12 = vpack.c.bf16 %v3513_v30, %v3511_v6 }
 0x5d2   : > { %v3522_v32 = vpack.c.bf16 %v3514_v8, %v3512_v28 }
 0x5d4   : > { %3707 = vmatprep.mubr.bf16.mxu0 %v3522_v32 }
 0x5d5   : > { %3708 = vmatmul.mubr.bf16.gmra.mrb[128].mxu0 %v3521_v12 }
 0x690   : > { %v4491_v17 = vpop.f32.mrb[116].mxu0 }
 0x691   : > { %v4492_v2 = vpop.f32.mrb[117].mxu0 }
 0x692   : > { %v4493_v42 = vadd.f32 %v4492_v2, %v4491_v17  ;;  %v4494_v43 = vpop.f32.mrb[118].mxu0 }
 0x693   : > { %v4495_v46 = vpop.f32.mrb[119].mxu0 }
 0x694   : > { %v3716_v52 = vadd.f32 %v4493_v42, %v3324_v40  ;;  %v4496_v35 = vadd.f32 %v4495_v46, %v4494_v43 }
 0x696   : > { %v3724_v22 = vadd.f32 %v3716_v52, %v709_v19  ;;  %v3717_v55 = vadd.f32 %v4496_v35, %v3329_v47 }
 0x698   : > { %4941 = vtanh.f32 %v3724_v22  ;;  %v3725_v60 = vadd.f32 %v3717_v55, %v711_v44  ;;  %v4497_v63 = vpop.f32.mrb[120].mxu0 }
 0x699   : > { %v4498_v11 = vpop.f32.mrb[121].mxu0 }
 0x69a   : > { %4943 = vtanh.f32 %v3725_v60  ;;  %v4499_v0 = vadd.f32 %v4498_v11, %v4497_v63  ;;  %v4500_v1 = vpop.f32.mrb[122].mxu0 }
 0x69b   : > { %v4501_v59 = vpop.f32.mrb[123].mxu0 }
 0x69c   : > { %v3718_v5 = vadd.f32 %v4499_v0, %v3334_v29  ;;  %v4502_v7 = vadd.f32 %v4501_v59, %v4500_v1 }
 0x69e   : > { %v3726_v10 = vadd.f32 %v3718_v5, %v713_v39  ;;  %v3719_v33 = vadd.f32 %v4502_v7, %v3339_v21 }
 0x6a0   : > { %4945 = vtanh.f32 %v3726_v10  ;;  %v3727_v58 = vadd.f32 %v3719_v33, %v715_v9  ;;  %v4503_v15 = vpop.f32.mrb[124].mxu0 }
 0x6a1   : > { %v4504_v57 = vpop.f32.mrb[125].mxu0 }
 0x6a2   : > { %v4942_v16 = vpop.eup %4941  ;;  %4947 = vtanh.f32 %v3727_v58  ;;  %v4505_v49 = vadd.f32 %v4504_v57, %v4503_v15  ;;  %v4506_v62 = vpop.f32.mrb[126].mxu0 }
 0x6a3   : > { %3740 = vst [vmem:[%s6485_s21] sm:$0xff] %v4942_v16  ;;  %v4507_v56 = vpop.f32.mrb[127].mxu0 }
 0x6a4   : > { %v4944_v37 = vpop.eup %4943  ;;  %v3720_v27 = vadd.f32 %v4505_v49, %v3344_v31  ;;  %v4508_v50 = vadd.f32 %v4507_v56, %v4506_v62 }
 0x6a5   : > { %3741 = vst [vmem:[%s6485_s21 + $0x8] sm:$0xff] %v4944_v37 }
 0x6a6   : > { %v3728_v45 = vadd.f32 %v3720_v27, %v717_v53  ;;  %v3721_v41 = vadd.f32 %v4508_v50, %v3349_v18 }
 0x6a8   : > { %4949 = vtanh.f32 %v3728_v45  ;;  %v3729_v51 = vadd.f32 %v3721_v41, %v719_v14  ;;  %v4509_v3 = vpop.f32.mrb[128].mxu0 }
 0x6a9   : > { %v4510_v54 = vpop.f32.mrb[129].mxu0 }
 0x6aa   : > { %v4946_v36 = vpop.eup %4945  ;;  %4951 = vtanh.f32 %v3729_v51  ;;  %v4511_v13 = vadd.f32 %v4510_v54, %v4509_v3  ;;  %v4512_v23 = vpop.f32.mrb[130].mxu0 }
 0x6ab   : > { %3742 = vst [vmem:[%s6485_s21 + $0x10] sm:$0xff] %v4946_v36  ;;  %v4513_v24 = vpop.f32.mrb[131].mxu0 }
 0x6ac   : > { %v4948_v26 = vpop.eup %4947  ;;  %v3722_v6 = vadd.f32 %v4511_v13, %v3354_v20  ;;  %v4514_v30 = vadd.f32 %v4513_v24, %v4512_v23 }
 0x6ad   : > { %3743 = vst [vmem:[%s6485_s21 + $0x18] sm:$0xff] %v4948_v26 }
 0x6ae   : > { %v3730_v4 = vadd.f32 %v3722_v6, %v721_v25  ;;  %v3723_v28 = vadd.f32 %v4514_v30, %v3359_v38 }
 0x6b0   : > { %4953 = vtanh.f32 %v3730_v4  ;;  %v3731_v8 = vadd.f32 %v3723_v28, %v723_v48 }
 0x6b2   : > { %v4950_v12 = vpop.eup %4949  ;;  %4955 = vtanh.f32 %v3731_v8 }
 0x6b3   : > { %3744 = vst [vmem:[%s6485_s21 + $0x20] sm:$0xff] %v4950_v12 }
 0x6b4   : > { %v4952_v32 = vpop.eup %4951 }
 0x6b5   : > { %3745 = vst [vmem:[%s6485_s21 + $0x28] sm:$0xff] %v4952_v32 }
 0x6ba   : > { %v4954_v34 = vpop.eup %4953 }
 0x6bb   : > { %3746 = vst [vmem:[%s6485_s21 + $0x30] sm:$0xff] %v4954_v34 }
 0x6bc   : > { %v4956_v61 = vpop.eup %4955 }
 0x6bd   : > { %3747 = vst [vmem:[%s6485_s21 + $0x38] sm:$0xff] %v4956_v61 }
 0x6be   : > { %5180 = shalt.err (!%p5177_p12)
}
 0x6bf   : > { %s5181_s28 = scalar_lea.hbm %s6508_s0, 1024  ;;  %s5185_s7 = scalar_lea.hbm %s6666_s20, 4096 }
 0x6c0   : > { %p5182_p6 = scmp.ne.s32.totalorder %s6508_s0, %s5181_s28  ;;  %p5186_p7 = scmp.lt.u32.totalorder %s6508_s0, %s6666_s20 }
 0x6c1   : > { %p5187_p1 = scmp.lt.u32.totalorder %s5185_s7, %s5181_s28  ;;  %p5189_p5 = scmp.lt.u32.totalorder %s5181_s28, %s6508_s0 }
 0x6c2   : > { %p5183_p0 = pnand %p5182_p6, %p6667_p10 }
 0x6c3   : > { %p5188_p2 = por %p5187_p1, %p5186_p7 }
 0x6c4   : > { %p5184_p3 = pneg %p5183_p0 }
 0x6c5   : > { %p5190_p11 = por %p5189_p5, %p5188_p2 }
 0x6c7   : > { %p5191_p9 = pnand %p5190_p11, %p5184_p3 }
 0x6c9   : > { %5194 = shalt.err (!%p5191_p9)
}
 0x6ca   : > { %s5266_s21 = smov 128   ;;  %s5267_s23 = smov 8  }
 0x6cb   : > { %4697 = dma.vmem_to_hbm [thread:$0]  (%p6667_p10), %s6510_s19, 1024, %s6508_s0, %s3749_s26, %s5266_s21, %s5266_s21, %s5267_s23  }
 0x6cc PF: > { %s6668_s11 = sld [smem:[#allocation20_spill]]  ;;  %s6669_s6 = sld [smem:[#allocation22_spill]] }
 0x6cd   : > { %p4735_p4 = scmp.ge.s32.totalorder %s5245_s24, 2 }
 0x6d2   : > { %s3777_s17 = sand.u32 1, %s6668_s11   ;;  %p6670_p8 = scmp.ne.s32.totalorder %s6669_s6, 0 }
 0x6d3   : > { %s3778_s25 = scalar_lea.sflag [#allocation4], %s3777_s17 }
 0x6d4   : > { %p4723_p13 = pnand %p4735_p4, %p6670_p8 }
 0x6d6   : > { %5228 = dma.done.wait (!%p4723_p13), %s3778_s25, 1024  }
 0x6d7   : > { %5230 = vsyncadd (!%p4723_p13), %s3778_s25, 4294966272  ;;  %s6671_s24 = sld [smem:[#allocation23_spill]]  ;;  %s6672_s2 = sld [smem:[#allocation21_spill]] }
 0x6d8   : > { %s6673_s23 = sld [smem:[#allocation24_spill]]  ;;  %s6674_s21 = smov %s5237_s22 }
 0x6dd   : > { %p34_p12 = scmp.ge.s32.totalorder %s6671_s24, 6   ;;  %s6675_s22 = smov %s6672_s2 }
 0x6df   :  { %36 = sbr.rel (!%p34_p12) target bundleno = 23 (0x17), region = 172 }
 0x6e6   :  { %3783 = vsyncpa [#allocation3], 1 }
 0x6e7   :  { %3785 = vsyncpa [#allocation3 + $0x1], 1 }
 0x6e8   :  { %3786 = vsyncpa [#allocation6], 1 }
 0x6e9   :  { %3788 = vsyncpa [#allocation6 + $0x1], 1 }
 0x6ea   :  { %3789 = vsyncpa [#allocation9], 1 }
 0x6eb   :  { %3790 = vsyncpa [#allocation12], 1 }
 0x6ec   :  { %3791 = vsyncpa [#allocation4], 1 }
 0x6ed   :  { %3793 = vsyncpa [#allocation4 + $0x1], 1 }

</bundles_post_ra>
